<compile_context>
chip_gen: v7x
topology: tpu7x:2x2x1
jax: 0.10.0
libtpu: 0.0.40
codegen_flags: <defaults>
</compile_context>

<pallas_src>
import jax
import jax.numpy as jnp
from jax.experimental import pallas as pl
from jax.experimental.pallas import tpu as pltpu


# ------------------------------ Pallas kernel ------------------------------

def _make_block_kernel(*, s, KH, KW, H, W, Hs, Ws, Ho, Wo, Cin, Cout, pad,
                       equal_inout, out_dtype):
    """Fully fused BasicBlock body for one image (NHWC, phase-decomposed in)."""
    ss = s * s
    KK = KH * KW

    def kernel(xph_ref, scale1_ref, shift1_ref, w1_ref,
               scale2_ref, shift2_ref, w2_ref, o_ref,
               act1_ref, col1_ref, act2p_ref, col2_ref):
        f32 = jnp.float32

        # ---- stage 1: BN1 + ReLU, applied ONCE over the whole tile ----------
        # Zero the scratch, then activate only the statically-known rectangle
        # of real pixels inside every stride phase; the padding ring stays
        # zero so the convolution still sees zero padding.  No HBM mask input,
        # no redundant per-tap activation.
        act1_ref[...] = jnp.zeros_like(act1_ref)
        scale1 = scale1_ref[...].astype(f32).reshape(1, 1, Cin)
        shift1 = shift1_ref[...].astype(f32).reshape(1, 1, Cin)
        for f in range(ss):
            ph, pw = divmod(f, s)
            a0 = max(0, -((ph - pad) // s))
            a1 = min(Hs, (H + pad - ph - 1) // s + 1)
            b0 = max(0, -((pw - pad) // s))
            b1 = min(Ws, (W + pad - pw - 1) // s + 1)
            xt = xph_ref[0, f, a0:a1, b0:b1, :].astype(f32)
            act1_ref[f, a0:a1, b0:b1, :] = jnp.maximum(
                xt * scale1 + shift1, 0.0)

        # ---- stage 2: conv1 (+ fused 1x1 shortcut) as ONE deep-K GEMM -------
        # im2col over the activated scratch: K = KH*KW*Cin.  The shortcut's
        # 1x1 stride-s conv is folded in as extra output columns of w1 whose
        # rows are non-zero only in the centre-tap block.
        for t in range(KK):
            kh, kw = divmod(t, KW)
            qh, ph = divmod(kh, s)
            qw, pw = divmod(kw, s)
            col1_ref[:, t * Cin:(t + 1) * Cin] = (
                act1_ref[ph * s + pw, qh:qh + Ho, qw:qw + Wo, :]
                .reshape(Ho * Wo, Cin))
        r1 = jnp.dot(col1_ref[...], w1_ref[...].astype(f32),
                     precision=jax.lax.Precision.HIGHEST,
                     preferred_element_type=f32)        # (Ho*Wo, Cout[+Cout])

        # ---- stage 3: BN2 + ReLU (dropout is identity at drop_rate = 0) -----
        scale2 = scale2_ref[...].astype(f32)
        shift2 = shift2_ref[...].astype(f32)
        act2 = jnp.maximum(r1[:, :Cout] * scale2 + shift2, 0.0)

        # zero-padded copy of act2 kept in VMEM for the stride-1 3x3 conv2
        act2p_ref[...] = jnp.zeros_like(act2p_ref)
        act2p_ref[pad:pad + Ho, pad:pad + Wo, :] = act2.reshape(Ho, Wo, Cout)

        # ---- stage 4: conv2 as ONE deep-K GEMM -------------------------------
        for t in range(KK):
            kh, kw = divmod(t, KW)
            col2_ref[:, t * Cout:(t + 1) * Cout] = (
                act2p_ref[kh:kh + Ho, kw:kw + Wo, :].reshape(Ho * Wo, Cout))
        r2 = jnp.dot(col2_ref[...], w2_ref[...].astype(f32),
                     precision=jax.lax.Precision.HIGHEST,
                     preferred_element_type=f32)        # (Ho*Wo, Cout)

        # ---- stage 5: residual add + single store ----------------------------
        if equal_inout:
            # residual = raw x (stride is 1 here): it is the centre window of
            # the already-resident padded input tile -> no extra HBM read.
            res = (xph_ref[0, 0, pad:pad + Ho, pad:pad + Wo, :]
                   .astype(f32).reshape(Ho * Wo, Cout))
        else:
            res = r1[:, Cout:]                          # fused shortcut conv
        out = r2 + res
        o_ref[0] = out.reshape(Ho, Wo, Cout).astype(out_dtype)

    return kernel


# --------------------------------- wrapper ---------------------------------

def basic_block_forward_nhwc(x, p, *, stride, equal_inout):
    """NHWC BasicBlock forward (eval mode, drop_rate = 0), one pallas_call."""
    N, H, W, Cin = x.shape
    w1, w2 = p["w1"], p["w2"]
    KH, KW, Cin2, Cout = w1.shape
    assert Cin2 == Cin
    s = int(stride)
    pad = 1                                  # conv1 / conv2: 3x3, padding=1
    ss = s * s
    KK = KH * KW
    Ho = (H + 2 * pad - KH) // s + 1
    Wo = (W + 2 * pad - KW) // s + 1
    Hs = -(-(H + 2 * pad) // s)
    Ws = -(-(W + 2 * pad) // s)
    Hp, Wp = s * Hs, s * Ws
    dt = x.dtype

    # --- loud guards for the static tap / phase / shortcut index math -------
    for k in range(KH):
        assert k // s + Ho <= Hs, "tap row window exceeds phase plane"
    for k in range(KW):
        assert k // s + Wo <= Ws, "tap col window exceeds phase plane"
    if equal_inout:
        assert s == 1 and Cin == Cout, "identity residual needs stride 1"
    else:
        assert pad < KH and pad < KW, "shortcut fusion needs a centre tap"
        assert (H - 1) // s + 1 == Ho and (W - 1) // s + 1 == Wo, \
            "1x1 shortcut output shape mismatch"

    # --- layout glue: zero pad + stride-phase space-to-depth (pure XLA) -----
    #   xph[n, ph*s + pw, a, b, c] == x_padded[n, a*s + ph, b*s + pw, c]
    xp = jnp.pad(x, ((0, 0), (pad, Hp - H - pad), (pad, Wp - W - pad), (0, 0)))
    xph = xp.reshape(N, Hs, s, Ws, s, Cin).transpose(0, 2, 4, 1, 3, 5)
    xph = xph.reshape(N, ss, Hs, Ws, Cin)

    # --- weights as GEMM matrices; fold the 1x1 shortcut into conv1's GEMM --
    w1mat = w1.reshape(KK * Cin, Cout).astype(jnp.float32)
    if equal_inout:
        w1c, Cw1 = w1mat, Cout
    else:
        ws = p["ws"].reshape(Cin, Cout).astype(jnp.float32)
        ctr = pad * KW + pad                 # centre tap == 1x1 stride-s conv
        wsc = jnp.zeros((KK * Cin, Cout), jnp.float32)
        wsc = wsc.at[ctr * Cin:(ctr + 1) * Cin, :].set(ws)
        w1c = jnp.concatenate([w1mat, wsc], axis=1)
        Cw1 = 2 * Cout
    w2mat = w2.reshape(KK * Cout, Cout).astype(jnp.float32)

    scale1 = p["scale1"].reshape(1, Cin).astype(jnp.float32)
    shift1 = p["shift1"].reshape(1, Cin).astype(jnp.float32)
    scale2 = p["scale2"].reshape(1, Cout).astype(jnp.float32)
    shift2 = p["shift2"].reshape(1, Cout).astype(jnp.float32)

    kernel = _make_block_kernel(
        s=s, KH=KH, KW=KW, H=H, W=W, Hs=Hs, Ws=Ws, Ho=Ho, Wo=Wo,
        Cin=Cin, Cout=Cout, pad=pad, equal_inout=equal_inout, out_dtype=dt)

    out = pl.pallas_call(
        kernel,
        out_shape=jax.ShapeDtypeStruct((N, Ho, Wo, Cout), dt),
        grid=(N,),
        in_specs=[
            pl.BlockSpec((1, ss, Hs, Ws, Cin), lambda n: (n, 0, 0, 0, 0)),
            pl.BlockSpec((1, Cin), lambda n: (0, 0)),
            pl.BlockSpec((1, Cin), lambda n: (0, 0)),
            pl.BlockSpec((KK * Cin, Cw1), lambda n: (0, 0)),
            pl.BlockSpec((1, Cout), lambda n: (0, 0)),
            pl.BlockSpec((1, Cout), lambda n: (0, 0)),
            pl.BlockSpec((KK * Cout, Cout), lambda n: (0, 0)),
        ],
        out_specs=pl.BlockSpec((1, Ho, Wo, Cout), lambda n: (n, 0, 0, 0)),
        scratch_shapes=[
            pltpu.VMEM((ss, Hs, Ws, Cin), jnp.float32),          # activated x
            pltpu.VMEM((Ho * Wo, KK * Cin), jnp.float32),        # im2col conv1
            pltpu.VMEM((Ho + 2 * pad, Wo + 2 * pad, Cout), jnp.float32),
            pltpu.VMEM((Ho * Wo, KK * Cout), jnp.float32),       # im2col conv2
        ],
        compiler_params=pltpu.CompilerParams(
            dimension_semantics=("parallel",)),
    )(xph, scale1, shift1, w1c, scale2, shift2, w2mat)
    return out


def basic_block_forward(x_nchw, p, *, stride, equal_inout):
    x = jnp.transpose(x_nchw, (0, 2, 3, 1))                # NCHW -> NHWC
    out = basic_block_forward_nhwc(x, p, stride=stride,
                                   equal_inout=equal_inout)
    return jnp.transpose(out, (0, 3, 1, 2))                # NHWC -> NCHW


# ---------------------------- pure-JAX reference ----------------------------

def _conv_ref(x, w, stride, padding):
    return jax.lax.conv_general_dilated(
        x, w, window_strides=(stride, stride),
        padding=((padding, padding), (padding, padding)),
        dimension_numbers=("NHWC", "HWIO", "NHWC"),
        precision=jax.lax.Precision.HIGHEST)


def basic_block_ref(x_nchw, p, *, stride, equal_inout):
    x = jnp.transpose(x_nchw, (0, 2, 3, 1))
    act = jnp.maximum(
        x * p["scale1"].reshape(1, 1, 1, -1) + p["shift1"].reshape(1, 1, 1, -1),
        0.0)
    out = _conv_ref(act, p["w1"], stride, 1)
    out = jnp.maximum(
        out * p["scale2"].reshape(1, 1, 1, -1) + p["shift2"].reshape(1, 1, 1, -1),
        0.0)
    shortcut = x if equal_inout else _conv_ref(act, p["ws"], stride, 0)
    out = _conv_ref(out, p["w2"], 1, 1) + shortcut
    return jnp.transpose(out, (0, 3, 1, 2))


# ----------------------------------- main -----------------------------------

if __name__ == "__main__":
    key = jax.random.PRNGKey(0)
    ks = jax.random.split(key, 12)

    N, in_planes, H, W = 2, 4, 16, 16
    out_planes, stride, drop_rate = 8, 2, 0.0
    equal_inout = in_planes == out_planes
    eps = 1e-5

    x = jax.random.normal(ks[0], (N, in_planes, H, W), jnp.float32)

    # deterministic synthetic parameters (shapes per BasicBlock.__init__)
    g1 = 1.0 + 0.1 * jax.random.normal(ks[1], (in_planes,), jnp.float32)
    b1 = 0.1 * jax.random.normal(ks[2], (in_planes,), jnp.float32)
    m1 = 0.1 * jax.random.normal(ks[3], (in_planes,), jnp.float32)
    v1 = jax.random.uniform(ks[4], (in_planes,), jnp.float32, 0.5, 1.5)
    g2 = 1.0 + 0.1 * jax.random.normal(ks[5], (out_planes,), jnp.float32)
    b2 = 0.1 * jax.random.normal(ks[6], (out_planes,), jnp.float32)
    m2 = 0.1 * jax.random.normal(ks[7], (out_planes,), jnp.float32)
    v2 = jax.random.uniform(ks[8], (out_planes,), jnp.float32, 0.5, 1.5)
    w1 = jax.random.normal(ks[9], (3, 3, in_planes, out_planes),
                           jnp.float32) / jnp.sqrt(9.0 * in_planes)
    w2 = jax.random.normal(ks[10], (3, 3, out_planes, out_planes),
                           jnp.float32) / jnp.sqrt(9.0 * out_planes)
    ws = jax.random.normal(ks[11], (1, 1, in_planes, out_planes),
                           jnp.float32) / jnp.sqrt(1.0 * in_planes)

    # fold eval-mode BatchNorm into per-channel scale/shift
    scale1 = g1 / jnp.sqrt(v1 + eps)
    shift1 = b1 - m1 * scale1
    scale2 = g2 / jnp.sqrt(v2 + eps)
    shift2 = b2 - m2 * scale2

    params = dict(scale1=scale1, shift1=shift1, scale2=scale2, shift2=shift2,
                  w1=w1, w2=w2, ws=ws)

    out = basic_block_forward(x, params, stride=stride,
                              equal_inout=equal_inout)
    out = jax.block_until_ready(out)

    ref = basic_block_ref(x, params, stride=stride, equal_inout=equal_inout)
    assert out.shape == (N, out_planes, H // stride, W // stride), out.shape
    # f32 end-to-end with HIGHEST-precision matmuls in both kernel and
    # reference -> tight tolerance is justified.
    assert bool(jnp.allclose(out, ref, rtol=1e-3, atol=1e-3)), \
        float(jnp.max(jnp.abs(out - ref)))

    print("KERNEL_OK")
</pallas_src>

<mosaic_0001>
module attributes {stable_mosaic.version = 11 : i64} {
  func.func @kernel(%arg0: i32, %arg1: memref<1x4x9x9x4xf32, #tpu.memory_space<vmem>>, %arg2: memref<1x4xf32, #tpu.memory_space<vmem>>, %arg3: memref<1x4xf32, #tpu.memory_space<vmem>>, %arg4: memref<36x16xf32, #tpu.memory_space<vmem>>, %arg5: memref<1x8xf32, #tpu.memory_space<vmem>>, %arg6: memref<1x8xf32, #tpu.memory_space<vmem>>, %arg7: memref<72x8xf32, #tpu.memory_space<vmem>>, %arg8: memref<1x8x8x8xf32, #tpu.memory_space<vmem>>, %arg9: memref<4x9x9x4xf32, #tpu.memory_space<vmem>>, %arg10: memref<64x36xf32, #tpu.memory_space<vmem>>, %arg11: memref<10x10x8xf32, #tpu.memory_space<vmem>>, %arg12: memref<64x72xf32, #tpu.memory_space<vmem>>) attributes {dimension_semantics = [#tpu.dimension_semantics<parallel>], iteration_bounds = array<i64: 2>, scalar_prefetch = 0 : i64, scratch_operands = 4 : i64, tpu.core_type = #tpu.core_type<tc>, window_params = [{transform_indices = @transform_0, window_bounds = array<i64: 1, 4, 9, 9, 4>}, {pipeline_mode = #tpu.pipeline_mode<synchronous>, transform_indices = @transform_1, window_bounds = array<i64: 1, 4>}, {pipeline_mode = #tpu.pipeline_mode<synchronous>, transform_indices = @transform_2, window_bounds = array<i64: 1, 4>}, {pipeline_mode = #tpu.pipeline_mode<synchronous>, transform_indices = @transform_3, window_bounds = array<i64: 36, 16>}, {pipeline_mode = #tpu.pipeline_mode<synchronous>, transform_indices = @transform_4, window_bounds = array<i64: 1, 8>}, {pipeline_mode = #tpu.pipeline_mode<synchronous>, transform_indices = @transform_5, window_bounds = array<i64: 1, 8>}, {pipeline_mode = #tpu.pipeline_mode<synchronous>, transform_indices = @transform_6, window_bounds = array<i64: 72, 8>}, {transform_indices = @transform_7, window_bounds = array<i64: 1, 8, 8, 8>}]} {
    %cst = arith.constant 0.000000e+00 : f32
    %0 = vector.broadcast %cst : f32 to vector<4x9x9x4xf32>
    %c0 = arith.constant 0 : index
    %c0_0 = arith.constant 0 : index
    %c0_1 = arith.constant 0 : index
    %c0_2 = arith.constant 0 : index
    %1 = vector.load %arg9[%c0, %c0_0, %c0_1, %c0_2] : memref<4x9x9x4xf32, #tpu.memory_space<vmem>>, vector<4x9x9x4xf32>
    tpu.vector_store %arg9[%c0, %c0_0, %c0_1, %c0_2], %0 {strides = array<i32>} : memref<4x9x9x4xf32, #tpu.memory_space<vmem>>, vector<4x9x9x4xf32>,
    %c0_3 = arith.constant 0 : index
    %c0_4 = arith.constant 0 : index
    %2 = vector.load %arg2[%c0_3, %c0_4] : memref<1x4xf32, #tpu.memory_space<vmem>>, vector<1x4xf32>
    %3 = vector.shape_cast %2 : vector<1x4xf32> to vector<1x1x4xf32>
    %c0_5 = arith.constant 0 : index
    %c0_6 = arith.constant 0 : index
    %4 = vector.load %arg3[%c0_5, %c0_6] : memref<1x4xf32, #tpu.memory_space<vmem>>, vector<1x4xf32>
    %5 = vector.shape_cast %4 : vector<1x4xf32> to vector<1x1x4xf32>
    %c0_7 = arith.constant 0 : index
    %c0_8 = arith.constant 0 : index
    %c1 = arith.constant 1 : index
    %c1_9 = arith.constant 1 : index
    %c0_10 = arith.constant 0 : index
    %6 = vector.load %arg1[%c0_7, %c0_8, %c1, %c1_9, %c0_10] : memref<1x4x9x9x4xf32, #tpu.memory_space<vmem>>, vector<1x1x8x8x4xf32>
    %7 = vector.shape_cast %6 : vector<1x1x8x8x4xf32> to vector<8x8x4xf32>
    %8 = vector.broadcast %3 : vector<1x1x4xf32> to vector<8x8x4xf32>
    %9 = arith.mulf %7, %8 : vector<8x8x4xf32>
    %10 = vector.broadcast %5 : vector<1x1x4xf32> to vector<8x8x4xf32>
    %11 = arith.addf %9, %10 : vector<8x8x4xf32>
    %cst_11 = arith.constant 0.000000e+00 : f32
    %12 = vector.broadcast %cst_11 : f32 to vector<8x8x4xf32>
    %13 = arith.maximumf %11, %12 : vector<8x8x4xf32>
    %c0_12 = arith.constant 0 : index
    %c1_13 = arith.constant 1 : index
    %c1_14 = arith.constant 1 : index
    %c0_15 = arith.constant 0 : index
    %14 = vector.load %arg9[%c0_12, %c1_13, %c1_14, %c0_15] : memref<4x9x9x4xf32, #tpu.memory_space<vmem>>, vector<1x8x8x4xf32>
    %15 = vector.shape_cast %14 : vector<1x8x8x4xf32> to vector<8x8x4xf32>
    %16 = vector.shape_cast %13 : vector<8x8x4xf32> to vector<1x8x8x4xf32>
    tpu.vector_store %arg9[%c0_12, %c1_13, %c1_14, %c0_15], %16 {strides = array<i32>} : memref<4x9x9x4xf32, #tpu.memory_space<vmem>>, vector<1x8x8x4xf32>,
    %c0_16 = arith.constant 0 : index
    %c1_17 = arith.constant 1 : index
    %c1_18 = arith.constant 1 : index
    %c0_19 = arith.constant 0 : index
    %c0_20 = arith.constant 0 : index
    %17 = vector.load %arg1[%c0_16, %c1_17, %c1_18, %c0_19, %c0_20] : memref<1x4x9x9x4xf32, #tpu.memory_space<vmem>>, vector<1x1x8x8x4xf32>
    %18 = vector.shape_cast %17 : vector<1x1x8x8x4xf32> to vector<8x8x4xf32>
    %19 = vector.broadcast %3 : vector<1x1x4xf32> to vector<8x8x4xf32>
    %20 = arith.mulf %18, %19 : vector<8x8x4xf32>
    %21 = vector.broadcast %5 : vector<1x1x4xf32> to vector<8x8x4xf32>
    %22 = arith.addf %20, %21 : vector<8x8x4xf32>
    %cst_21 = arith.constant 0.000000e+00 : f32
    %23 = vector.broadcast %cst_21 : f32 to vector<8x8x4xf32>
    %24 = arith.maximumf %22, %23 : vector<8x8x4xf32>
    %c1_22 = arith.constant 1 : index
    %c1_23 = arith.constant 1 : index
    %c0_24 = arith.constant 0 : index
    %c0_25 = arith.constant 0 : index
    %25 = vector.load %arg9[%c1_22, %c1_23, %c0_24, %c0_25] : memref<4x9x9x4xf32, #tpu.memory_space<vmem>>, vector<1x8x8x4xf32>
    %26 = vector.shape_cast %25 : vector<1x8x8x4xf32> to vector<8x8x4xf32>
    %27 = vector.shape_cast %24 : vector<8x8x4xf32> to vector<1x8x8x4xf32>
    tpu.vector_store %arg9[%c1_22, %c1_23, %c0_24, %c0_25], %27 {strides = array<i32>} : memref<4x9x9x4xf32, #tpu.memory_space<vmem>>, vector<1x8x8x4xf32>,
    %c0_26 = arith.constant 0 : index
    %c2 = arith.constant 2 : index
    %c0_27 = arith.constant 0 : index
    %c1_28 = arith.constant 1 : index
    %c0_29 = arith.constant 0 : index
    %28 = vector.load %arg1[%c0_26, %c2, %c0_27, %c1_28, %c0_29] : memref<1x4x9x9x4xf32, #tpu.memory_space<vmem>>, vector<1x1x8x8x4xf32>
    %29 = vector.shape_cast %28 : vector<1x1x8x8x4xf32> to vector<8x8x4xf32>
    %30 = vector.broadcast %3 : vector<1x1x4xf32> to vector<8x8x4xf32>
    %31 = arith.mulf %29, %30 : vector<8x8x4xf32>
    %32 = vector.broadcast %5 : vector<1x1x4xf32> to vector<8x8x4xf32>
    %33 = arith.addf %31, %32 : vector<8x8x4xf32>
    %cst_30 = arith.constant 0.000000e+00 : f32
    %34 = vector.broadcast %cst_30 : f32 to vector<8x8x4xf32>
    %35 = arith.maximumf %33, %34 : vector<8x8x4xf32>
    %c2_31 = arith.constant 2 : index
    %c0_32 = arith.constant 0 : index
    %c1_33 = arith.constant 1 : index
    %c0_34 = arith.constant 0 : index
    %36 = vector.load %arg9[%c2_31, %c0_32, %c1_33, %c0_34] : memref<4x9x9x4xf32, #tpu.memory_space<vmem>>, vector<1x8x8x4xf32>
    %37 = vector.shape_cast %36 : vector<1x8x8x4xf32> to vector<8x8x4xf32>
    %38 = vector.shape_cast %35 : vector<8x8x4xf32> to vector<1x8x8x4xf32>
    tpu.vector_store %arg9[%c2_31, %c0_32, %c1_33, %c0_34], %38 {strides = array<i32>} : memref<4x9x9x4xf32, #tpu.memory_space<vmem>>, vector<1x8x8x4xf32>,
    %c0_35 = arith.constant 0 : index
    %c3 = arith.constant 3 : index
    %c0_36 = arith.constant 0 : index
    %c0_37 = arith.constant 0 : index
    %c0_38 = arith.constant 0 : index
    %39 = vector.load %arg1[%c0_35, %c3, %c0_36, %c0_37, %c0_38] : memref<1x4x9x9x4xf32, #tpu.memory_space<vmem>>, vector<1x1x8x8x4xf32>
    %40 = vector.shape_cast %39 : vector<1x1x8x8x4xf32> to vector<8x8x4xf32>
    %41 = vector.broadcast %3 : vector<1x1x4xf32> to vector<8x8x4xf32>
    %42 = arith.mulf %40, %41 : vector<8x8x4xf32>
    %43 = vector.broadcast %5 : vector<1x1x4xf32> to vector<8x8x4xf32>
    %44 = arith.addf %42, %43 : vector<8x8x4xf32>
    %cst_39 = arith.constant 0.000000e+00 : f32
    %45 = vector.broadcast %cst_39 : f32 to vector<8x8x4xf32>
    %46 = arith.maximumf %44, %45 : vector<8x8x4xf32>
    %c3_40 = arith.constant 3 : index
    %c0_41 = arith.constant 0 : index
    %c0_42 = arith.constant 0 : index
    %c0_43 = arith.constant 0 : index
    %47 = vector.load %arg9[%c3_40, %c0_41, %c0_42, %c0_43] : memref<4x9x9x4xf32, #tpu.memory_space<vmem>>, vector<1x8x8x4xf32>
    %48 = vector.shape_cast %47 : vector<1x8x8x4xf32> to vector<8x8x4xf32>
    %49 = vector.shape_cast %46 : vector<8x8x4xf32> to vector<1x8x8x4xf32>
    tpu.vector_store %arg9[%c3_40, %c0_41, %c0_42, %c0_43], %49 {strides = array<i32>} : memref<4x9x9x4xf32, #tpu.memory_space<vmem>>, vector<1x8x8x4xf32>,
    %c0_44 = arith.constant 0 : index
    %c0_45 = arith.constant 0 : index
    %c0_46 = arith.constant 0 : index
    %c0_47 = arith.constant 0 : index
    %50 = vector.load %arg9[%c0_44, %c0_45, %c0_46, %c0_47] : memref<4x9x9x4xf32, #tpu.memory_space<vmem>>, vector<1x8x8x4xf32>
    %51 = vector.shape_cast %50 : vector<1x8x8x4xf32> to vector<8x8x4xf32>
    %52 = vector.shape_cast %51 : vector<8x8x4xf32> to vector<64x4xf32>
    %c0_48 = arith.constant 0 : index
    %c0_49 = arith.constant 0 : index
    %53 = vector.load %arg10[%c0_48, %c0_49] : memref<64x36xf32, #tpu.memory_space<vmem>>, vector<64x4xf32>
    tpu.vector_store %arg10[%c0_48, %c0_49], %52 {strides = array<i32>} : memref<64x36xf32, #tpu.memory_space<vmem>>, vector<64x4xf32>,
    %c1_50 = arith.constant 1 : index
    %c0_51 = arith.constant 0 : index
    %c0_52 = arith.constant 0 : index
    %c0_53 = arith.constant 0 : index
    %54 = vector.load %arg9[%c1_50, %c0_51, %c0_52, %c0_53] : memref<4x9x9x4xf32, #tpu.memory_space<vmem>>, vector<1x8x8x4xf32>
    %55 = vector.shape_cast %54 : vector<1x8x8x4xf32> to vector<8x8x4xf32>
    %56 = vector.shape_cast %55 : vector<8x8x4xf32> to vector<64x4xf32>
    %c0_54 = arith.constant 0 : index
    %c4 = arith.constant 4 : index
    %57 = vector.load %arg10[%c0_54, %c4] : memref<64x36xf32, #tpu.memory_space<vmem>>, vector<64x4xf32>
    tpu.vector_store %arg10[%c0_54, %c4], %56 {strides = array<i32>} : memref<64x36xf32, #tpu.memory_space<vmem>>, vector<64x4xf32>,
    %c0_55 = arith.constant 0 : index
    %c0_56 = arith.constant 0 : index
    %c1_57 = arith.constant 1 : index
    %c0_58 = arith.constant 0 : index
    %58 = vector.load %arg9[%c0_55, %c0_56, %c1_57, %c0_58] : memref<4x9x9x4xf32, #tpu.memory_space<vmem>>, vector<1x8x8x4xf32>
    %59 = vector.shape_cast %58 : vector<1x8x8x4xf32> to vector<8x8x4xf32>
    %60 = vector.shape_cast %59 : vector<8x8x4xf32> to vector<64x4xf32>
    %c0_59 = arith.constant 0 : index
    %c8 = arith.constant 8 : index
    %61 = vector.load %arg10[%c0_59, %c8] : memref<64x36xf32, #tpu.memory_space<vmem>>, vector<64x4xf32>
    tpu.vector_store %arg10[%c0_59, %c8], %60 {strides = array<i32>} : memref<64x36xf32, #tpu.memory_space<vmem>>, vector<64x4xf32>,
    %c2_60 = arith.constant 2 : index
    %c0_61 = arith.constant 0 : index
    %c0_62 = arith.constant 0 : index
    %c0_63 = arith.constant 0 : index
    %62 = vector.load %arg9[%c2_60, %c0_61, %c0_62, %c0_63] : memref<4x9x9x4xf32, #tpu.memory_space<vmem>>, vector<1x8x8x4xf32>
    %63 = vector.shape_cast %62 : vector<1x8x8x4xf32> to vector<8x8x4xf32>
    %64 = vector.shape_cast %63 : vector<8x8x4xf32> to vector<64x4xf32>
    %c0_64 = arith.constant 0 : index
    %c12 = arith.constant 12 : index
    %65 = vector.load %arg10[%c0_64, %c12] : memref<64x36xf32, #tpu.memory_space<vmem>>, vector<64x4xf32>
    tpu.vector_store %arg10[%c0_64, %c12], %64 {strides = array<i32>} : memref<64x36xf32, #tpu.memory_space<vmem>>, vector<64x4xf32>,
    %c3_65 = arith.constant 3 : index
    %c0_66 = arith.constant 0 : index
    %c0_67 = arith.constant 0 : index
    %c0_68 = arith.constant 0 : index
    %66 = vector.load %arg9[%c3_65, %c0_66, %c0_67, %c0_68] : memref<4x9x9x4xf32, #tpu.memory_space<vmem>>, vector<1x8x8x4xf32>
    %67 = vector.shape_cast %66 : vector<1x8x8x4xf32> to vector<8x8x4xf32>
    %68 = vector.shape_cast %67 : vector<8x8x4xf32> to vector<64x4xf32>
    %c0_69 = arith.constant 0 : index
    %c16 = arith.constant 16 : index
    %69 = vector.load %arg10[%c0_69, %c16] : memref<64x36xf32, #tpu.memory_space<vmem>>, vector<64x4xf32>
    tpu.vector_store %arg10[%c0_69, %c16], %68 {strides = array<i32>} : memref<64x36xf32, #tpu.memory_space<vmem>>, vector<64x4xf32>,
    %c2_70 = arith.constant 2 : index
    %c0_71 = arith.constant 0 : index
    %c1_72 = arith.constant 1 : index
    %c0_73 = arith.constant 0 : index
    %70 = vector.load %arg9[%c2_70, %c0_71, %c1_72, %c0_73] : memref<4x9x9x4xf32, #tpu.memory_space<vmem>>, vector<1x8x8x4xf32>
    %71 = vector.shape_cast %70 : vector<1x8x8x4xf32> to vector<8x8x4xf32>
    %72 = vector.shape_cast %71 : vector<8x8x4xf32> to vector<64x4xf32>
    %c0_74 = arith.constant 0 : index
    %c20 = arith.constant 20 : index
    %73 = vector.load %arg10[%c0_74, %c20] : memref<64x36xf32, #tpu.memory_space<vmem>>, vector<64x4xf32>
    tpu.vector_store %arg10[%c0_74, %c20], %72 {strides = array<i32>} : memref<64x36xf32, #tpu.memory_space<vmem>>, vector<64x4xf32>,
    %c0_75 = arith.constant 0 : index
    %c1_76 = arith.constant 1 : index
    %c0_77 = arith.constant 0 : index
    %c0_78 = arith.constant 0 : index
    %74 = vector.load %arg9[%c0_75, %c1_76, %c0_77, %c0_78] : memref<4x9x9x4xf32, #tpu.memory_space<vmem>>, vector<1x8x8x4xf32>
    %75 = vector.shape_cast %74 : vector<1x8x8x4xf32> to vector<8x8x4xf32>
    %76 = vector.shape_cast %75 : vector<8x8x4xf32> to vector<64x4xf32>
    %c0_79 = arith.constant 0 : index
    %c24 = arith.constant 24 : index
    %77 = vector.load %arg10[%c0_79, %c24] : memref<64x36xf32, #tpu.memory_space<vmem>>, vector<64x4xf32>
    tpu.vector_store %arg10[%c0_79, %c24], %76 {strides = array<i32>} : memref<64x36xf32, #tpu.memory_space<vmem>>, vector<64x4xf32>,
    %c1_80 = arith.constant 1 : index
    %c1_81 = arith.constant 1 : index
    %c0_82 = arith.constant 0 : index
    %c0_83 = arith.constant 0 : index
    %78 = vector.load %arg9[%c1_80, %c1_81, %c0_82, %c0_83] : memref<4x9x9x4xf32, #tpu.memory_space<vmem>>, vector<1x8x8x4xf32>
    %79 = vector.shape_cast %78 : vector<1x8x8x4xf32> to vector<8x8x4xf32>
    %80 = vector.shape_cast %79 : vector<8x8x4xf32> to vector<64x4xf32>
    %c0_84 = arith.constant 0 : index
    %c28 = arith.constant 28 : index
    %81 = vector.load %arg10[%c0_84, %c28] : memref<64x36xf32, #tpu.memory_space<vmem>>, vector<64x4xf32>
    tpu.vector_store %arg10[%c0_84, %c28], %80 {strides = array<i32>} : memref<64x36xf32, #tpu.memory_space<vmem>>, vector<64x4xf32>,
    %c0_85 = arith.constant 0 : index
    %c1_86 = arith.constant 1 : index
    %c1_87 = arith.constant 1 : index
    %c0_88 = arith.constant 0 : index
    %82 = vector.load %arg9[%c0_85, %c1_86, %c1_87, %c0_88] : memref<4x9x9x4xf32, #tpu.memory_space<vmem>>, vector<1x8x8x4xf32>
    %83 = vector.shape_cast %82 : vector<1x8x8x4xf32> to vector<8x8x4xf32>
    %84 = vector.shape_cast %83 : vector<8x8x4xf32> to vector<64x4xf32>
    %c0_89 = arith.constant 0 : index
    %c32 = arith.constant 32 : index
    %85 = vector.load %arg10[%c0_89, %c32] : memref<64x36xf32, #tpu.memory_space<vmem>>, vector<64x4xf32>
    tpu.vector_store %arg10[%c0_89, %c32], %84 {strides = array<i32>} : memref<64x36xf32, #tpu.memory_space<vmem>>, vector<64x4xf32>,
    %c0_90 = arith.constant 0 : index
    %c0_91 = arith.constant 0 : index
    %86 = vector.load %arg10[%c0_90, %c0_91] : memref<64x36xf32, #tpu.memory_space<vmem>>, vector<64x36xf32>
    %c0_92 = arith.constant 0 : index
    %c0_93 = arith.constant 0 : index
    %87 = vector.load %arg4[%c0_92, %c0_93] : memref<36x16xf32, #tpu.memory_space<vmem>>, vector<36x16xf32>
    %cst_94 = arith.constant dense<0.000000e+00> : vector<64x16xf32>
    %88 = tpu.matmul %86, %87, %cst_94 {dimension_numbers = #tpu.dot_dimension_numbers<[1], [0], [0], [1], [0, 0, 1, 1], [], []>, precision = #tpu.contract_precision<fp32>} : vector<64x36xf32>, vector<36x16xf32>, vector<64x16xf32> -> vector<64x16xf32>
    %c0_95 = arith.constant 0 : index
    %c0_96 = arith.constant 0 : index
    %89 = vector.load %arg5[%c0_95, %c0_96] : memref<1x8xf32, #tpu.memory_space<vmem>>, vector<1x8xf32>
    %c0_97 = arith.constant 0 : index
    %c0_98 = arith.constant 0 : index
    %90 = vector.load %arg6[%c0_97, %c0_98] : memref<1x8xf32, #tpu.memory_space<vmem>>, vector<1x8xf32>
    %91 = vector.extract_strided_slice %88 {offsets = [0, 0], sizes = [64, 8], strides = [1, 1]} : vector<64x16xf32> to vector<64x8xf32>
    %92 = vector.broadcast %89 : vector<1x8xf32> to vector<64x8xf32>
    %93 = arith.mulf %91, %92 : vector<64x8xf32>
    %94 = vector.broadcast %90 : vector<1x8xf32> to vector<64x8xf32>
    %95 = arith.addf %93, %94 : vector<64x8xf32>
    %cst_99 = arith.constant 0.000000e+00 : f32
    %96 = vector.broadcast %cst_99 : f32 to vector<64x8xf32>
    %97 = arith.maximumf %95, %96 : vector<64x8xf32>
    %cst_100 = arith.constant 0.000000e+00 : f32
    %98 = vector.broadcast %cst_100 : f32 to vector<10x10x8xf32>
    %c0_101 = arith.constant 0 : index
    %c0_102 = arith.constant 0 : index
    %c0_103 = arith.constant 0 : index
    %99 = vector.load %arg11[%c0_101, %c0_102, %c0_103] : memref<10x10x8xf32, #tpu.memory_space<vmem>>, vector<10x10x8xf32>
    tpu.vector_store %arg11[%c0_101, %c0_102, %c0_103], %98 {strides = array<i32>} : memref<10x10x8xf32, #tpu.memory_space<vmem>>, vector<10x10x8xf32>,
    %100 = vector.shape_cast %97 : vector<64x8xf32> to vector<8x8x8xf32>
    %c1_104 = arith.constant 1 : index
    %c1_105 = arith.constant 1 : index
    %c0_106 = arith.constant 0 : index
    %101 = vector.load %arg11[%c1_104, %c1_105, %c0_106] : memref<10x10x8xf32, #tpu.memory_space<vmem>>, vector<8x8x8xf32>
    tpu.vector_store %arg11[%c1_104, %c1_105, %c0_106], %100 {strides = array<i32>} : memref<10x10x8xf32, #tpu.memory_space<vmem>>, vector<8x8x8xf32>,
    %c0_107 = arith.constant 0 : index
    %c0_108 = arith.constant 0 : index
    %c0_109 = arith.constant 0 : index
    %102 = vector.load %arg11[%c0_107, %c0_108, %c0_109] : memref<10x10x8xf32, #tpu.memory_space<vmem>>, vector<8x8x8xf32>
    %103 = vector.shape_cast %102 : vector<8x8x8xf32> to vector<64x8xf32>
    %c0_110 = arith.constant 0 : index
    %c0_111 = arith.constant 0 : index
    %104 = vector.load %arg12[%c0_110, %c0_111] : memref<64x72xf32, #tpu.memory_space<vmem>>, vector<64x8xf32>
    tpu.vector_store %arg12[%c0_110, %c0_111], %103 {strides = array<i32>} : memref<64x72xf32, #tpu.memory_space<vmem>>, vector<64x8xf32>,
    %c0_112 = arith.constant 0 : index
    %c1_113 = arith.constant 1 : index
    %c0_114 = arith.constant 0 : index
    %105 = vector.load %arg11[%c0_112, %c1_113, %c0_114] : memref<10x10x8xf32, #tpu.memory_space<vmem>>, vector<8x8x8xf32>
    %106 = vector.shape_cast %105 : vector<8x8x8xf32> to vector<64x8xf32>
    %c0_115 = arith.constant 0 : index
    %c8_116 = arith.constant 8 : index
    %107 = vector.load %arg12[%c0_115, %c8_116] : memref<64x72xf32, #tpu.memory_space<vmem>>, vector<64x8xf32>
    tpu.vector_store %arg12[%c0_115, %c8_116], %106 {strides = array<i32>} : memref<64x72xf32, #tpu.memory_space<vmem>>, vector<64x8xf32>,
    %c0_117 = arith.constant 0 : index
    %c2_118 = arith.constant 2 : index
    %c0_119 = arith.constant 0 : index
    %108 = vector.load %arg11[%c0_117, %c2_118, %c0_119] : memref<10x10x8xf32, #tpu.memory_space<vmem>>, vector<8x8x8xf32>
    %109 = vector.shape_cast %108 : vector<8x8x8xf32> to vector<64x8xf32>
    %c0_120 = arith.constant 0 : index
    %c16_121 = arith.constant 16 : index
    %110 = vector.load %arg12[%c0_120, %c16_121] : memref<64x72xf32, #tpu.memory_space<vmem>>, vector<64x8xf32>
    tpu.vector_store %arg12[%c0_120, %c16_121], %109 {strides = array<i32>} : memref<64x72xf32, #tpu.memory_space<vmem>>, vector<64x8xf32>,
    %c1_122 = arith.constant 1 : index
    %c0_123 = arith.constant 0 : index
    %c0_124 = arith.constant 0 : index
    %111 = vector.load %arg11[%c1_122, %c0_123, %c0_124] : memref<10x10x8xf32, #tpu.memory_space<vmem>>, vector<8x8x8xf32>
    %112 = vector.shape_cast %111 : vector<8x8x8xf32> to vector<64x8xf32>
    %c0_125 = arith.constant 0 : index
    %c24_126 = arith.constant 24 : index
    %113 = vector.load %arg12[%c0_125, %c24_126] : memref<64x72xf32, #tpu.memory_space<vmem>>, vector<64x8xf32>
    tpu.vector_store %arg12[%c0_125, %c24_126], %112 {strides = array<i32>} : memref<64x72xf32, #tpu.memory_space<vmem>>, vector<64x8xf32>,
    %c1_127 = arith.constant 1 : index
    %c1_128 = arith.constant 1 : index
    %c0_129 = arith.constant 0 : index
    %114 = vector.load %arg11[%c1_127, %c1_128, %c0_129] : memref<10x10x8xf32, #tpu.memory_space<vmem>>, vector<8x8x8xf32>
    %115 = vector.shape_cast %114 : vector<8x8x8xf32> to vector<64x8xf32>
    %c0_130 = arith.constant 0 : index
    %c32_131 = arith.constant 32 : index
    %116 = vector.load %arg12[%c0_130, %c32_131] : memref<64x72xf32, #tpu.memory_space<vmem>>, vector<64x8xf32>
    tpu.vector_store %arg12[%c0_130, %c32_131], %115 {strides = array<i32>} : memref<64x72xf32, #tpu.memory_space<vmem>>, vector<64x8xf32>,
    %c1_132 = arith.constant 1 : index
    %c2_133 = arith.constant 2 : index
    %c0_134 = arith.constant 0 : index
    %117 = vector.load %arg11[%c1_132, %c2_133, %c0_134] : memref<10x10x8xf32, #tpu.memory_space<vmem>>, vector<8x8x8xf32>
    %118 = vector.shape_cast %117 : vector<8x8x8xf32> to vector<64x8xf32>
    %c0_135 = arith.constant 0 : index
    %c40 = arith.constant 40 : index
    %119 = vector.load %arg12[%c0_135, %c40] : memref<64x72xf32, #tpu.memory_space<vmem>>, vector<64x8xf32>
    tpu.vector_store %arg12[%c0_135, %c40], %118 {strides = array<i32>} : memref<64x72xf32, #tpu.memory_space<vmem>>, vector<64x8xf32>,
    %c2_136 = arith.constant 2 : index
    %c0_137 = arith.constant 0 : index
    %c0_138 = arith.constant 0 : index
    %120 = vector.load %arg11[%c2_136, %c0_137, %c0_138] : memref<10x10x8xf32, #tpu.memory_space<vmem>>, vector<8x8x8xf32>
    %121 = vector.shape_cast %120 : vector<8x8x8xf32> to vector<64x8xf32>
    %c0_139 = arith.constant 0 : index
    %c48 = arith.constant 48 : index
    %122 = vector.load %arg12[%c0_139, %c48] : memref<64x72xf32, #tpu.memory_space<vmem>>, vector<64x8xf32>
    tpu.vector_store %arg12[%c0_139, %c48], %121 {strides = array<i32>} : memref<64x72xf32, #tpu.memory_space<vmem>>, vector<64x8xf32>,
    %c2_140 = arith.constant 2 : index
    %c1_141 = arith.constant 1 : index
    %c0_142 = arith.constant 0 : index
    %123 = vector.load %arg11[%c2_140, %c1_141, %c0_142] : memref<10x10x8xf32, #tpu.memory_space<vmem>>, vector<8x8x8xf32>
    %124 = vector.shape_cast %123 : vector<8x8x8xf32> to vector<64x8xf32>
    %c0_143 = arith.constant 0 : index
    %c56 = arith.constant 56 : index
    %125 = vector.load %arg12[%c0_143, %c56] : memref<64x72xf32, #tpu.memory_space<vmem>>, vector<64x8xf32>
    tpu.vector_store %arg12[%c0_143, %c56], %124 {strides = array<i32>} : memref<64x72xf32, #tpu.memory_space<vmem>>, vector<64x8xf32>,
    %c2_144 = arith.constant 2 : index
    %c2_145 = arith.constant 2 : index
    %c0_146 = arith.constant 0 : index
    %126 = vector.load %arg11[%c2_144, %c2_145, %c0_146] : memref<10x10x8xf32, #tpu.memory_space<vmem>>, vector<8x8x8xf32>
    %127 = vector.shape_cast %126 : vector<8x8x8xf32> to vector<64x8xf32>
    %c0_147 = arith.constant 0 : index
    %c64 = arith.constant 64 : index
    %128 = vector.load %arg12[%c0_147, %c64] : memref<64x72xf32, #tpu.memory_space<vmem>>, vector<64x8xf32>
    tpu.vector_store %arg12[%c0_147, %c64], %127 {strides = array<i32>} : memref<64x72xf32, #tpu.memory_space<vmem>>, vector<64x8xf32>,
    %c0_148 = arith.constant 0 : index
    %c0_149 = arith.constant 0 : index
    %129 = vector.load %arg12[%c0_148, %c0_149] : memref<64x72xf32, #tpu.memory_space<vmem>>, vector<64x72xf32>
    %c0_150 = arith.constant 0 : index
    %c0_151 = arith.constant 0 : index
    %130 = vector.load %arg7[%c0_150, %c0_151] : memref<72x8xf32, #tpu.memory_space<vmem>>, vector<72x8xf32>
    %cst_152 = arith.constant dense<0.000000e+00> : vector<64x8xf32>
    %131 = tpu.matmul %129, %130, %cst_152 {dimension_numbers = #tpu.dot_dimension_numbers<[1], [0], [0], [1], [0, 0, 1, 1], [], []>, precision = #tpu.contract_precision<fp32>} : vector<64x72xf32>, vector<72x8xf32>, vector<64x8xf32> -> vector<64x8xf32>
    %132 = vector.extract_strided_slice %88 {offsets = [0, 8], sizes = [64, 8], strides = [1, 1]} : vector<64x16xf32> to vector<64x8xf32>
    %133 = arith.addf %131, %132 : vector<64x8xf32>
    %134 = vector.shape_cast %133 : vector<64x8xf32> to vector<8x8x8xf32>
    %c0_153 = arith.constant 0 : index
    %c0_154 = arith.constant 0 : index
    %c0_155 = arith.constant 0 : index
    %c0_156 = arith.constant 0 : index
    %135 = vector.load %arg8[%c0_153, %c0_154, %c0_155, %c0_156] : memref<1x8x8x8xf32, #tpu.memory_space<vmem>>, vector<1x8x8x8xf32>
    %136 = vector.shape_cast %135 : vector<1x8x8x8xf32> to vector<8x8x8xf32>
    %137 = vector.shape_cast %134 : vector<8x8x8xf32> to vector<1x8x8x8xf32>
    tpu.vector_store %arg8[%c0_153, %c0_154, %c0_155, %c0_156], %137 {strides = array<i32>} : memref<1x8x8x8xf32, #tpu.memory_space<vmem>>, vector<1x8x8x8xf32>,
    return
  }
  func.func @transform_0(%arg0: i32) -> (i32, i32, i32, i32, i32) {
    %c0_i32 = arith.constant 0 : i32
    %c0_i32_0 = arith.constant 0 : i32
    %c0_i32_1 = arith.constant 0 : i32
    %c0_i32_2 = arith.constant 0 : i32
    %c0_i32_3 = arith.constant 0 : i32
    return %arg0, %c0_i32, %c0_i32_0, %c0_i32_1, %c0_i32_2 : i32, i32, i32, i32, i32
  }
  func.func @transform_1(%arg0: i32) -> (i32, i32) {
    %c0_i32 = arith.constant 0 : i32
    %c0_i32_0 = arith.constant 0 : i32
    %c0_i32_1 = arith.constant 0 : i32
    return %c0_i32, %c0_i32_0 : i32, i32
  }
  func.func @transform_2(%arg0: i32) -> (i32, i32) {
    %c0_i32 = arith.constant 0 : i32
    %c0_i32_0 = arith.constant 0 : i32
    %c0_i32_1 = arith.constant 0 : i32
    return %c0_i32, %c0_i32_0 : i32, i32
  }
  func.func @transform_3(%arg0: i32) -> (i32, i32) {
    %c0_i32 = arith.constant 0 : i32
    %c0_i32_0 = arith.constant 0 : i32
    %c0_i32_1 = arith.constant 0 : i32
    return %c0_i32, %c0_i32_0 : i32, i32
  }
  func.func @transform_4(%arg0: i32) -> (i32, i32) {
    %c0_i32 = arith.constant 0 : i32
    %c0_i32_0 = arith.constant 0 : i32
    %c0_i32_1 = arith.constant 0 : i32
    return %c0_i32, %c0_i32_0 : i32, i32
  }
  func.func @transform_5(%arg0: i32) -> (i32, i32) {
    %c0_i32 = arith.constant 0 : i32
    %c0_i32_0 = arith.constant 0 : i32
    %c0_i32_1 = arith.constant 0 : i32
    return %c0_i32, %c0_i32_0 : i32, i32
  }
  func.func @transform_6(%arg0: i32) -> (i32, i32) {
    %c0_i32 = arith.constant 0 : i32
    %c0_i32_0 = arith.constant 0 : i32
    %c0_i32_1 = arith.constant 0 : i32
    return %c0_i32, %c0_i32_0 : i32, i32
  }
  func.func @transform_7(%arg0: i32) -> (i32, i32, i32, i32) {
    %c0_i32 = arith.constant 0 : i32
    %c0_i32_0 = arith.constant 0 : i32
    %c0_i32_1 = arith.constant 0 : i32
    %c0_i32_2 = arith.constant 0 : i32
    return %arg0, %c0_i32, %c0_i32_0, %c0_i32_1 : i32, i32, i32, i32
  }
}

</mosaic_0001>

<bundles_post_ra>
// kernel: tpu_custom_call.1
= control target key start
LH: loop header
LB: loop body
LE: loop exit
PB: predicated region body
PF: predicated region fallthrough
CT: control target
= control target key end

     0   :  { %12 = vsyncpa [#allocation7], 0  ;;  %s5596_s0 = inlined_call_operand.vmem [shape: f32[2,4,9,9,4], index: 0, kind: input, shape index: {}]   ;;  %s5597_s1 = inlined_call_operand.vmem [shape: f32[1,4], index: 1, kind: input, shape index: {}]   ;;  %s5598_s2 = inlined_call_operand.vmem [shape: f32[1,4], index: 2, kind: input, shape index: {}]   ;;  %s5599_s3 = inlined_call_operand.vmem [shape: f32[36,16], index: 3, kind: input, shape index: {}]   ;;  %s5600_s4 = inlined_call_operand.vmem [shape: f32[1,8], index: 4, kind: input, shape index: {}]   ;;  %s5601_s5 = inlined_call_operand.vmem [shape: f32[1,8], index: 5, kind: input, shape index: {}]   ;;  %s5602_s6 = inlined_call_operand.vmem [shape: f32[72,8], index: 6, kind: input, shape index: {}]   ;;  %s5603_s7 = inlined_call_operand.hbm [shape: f32[2,8,8,8], index: 7, kind: output, shape index: {}]  }
   0x1   :  { %14 = vsyncpa [#allocation7 + $0x1], 0  ;;  %s4227_s24 = smov 0   ;;  %s4229_s25 = smov 0  }
   0x2   :  { %s4231_s26 = smov 0   ;;  %s4233_s27 = smov 0  }
   0x3 LB: > { %s4248_s28 = sadd.s32 4294967295, %s4169_s27   ;;  %s3270_s29 = sadd.s32 4294967294, %s4169_s27   ;;  %s4169_s27 = sphi %s4233_s27, %s5609_s27   ;;  %s4165_s26 = sphi %s4231_s26, %s5608_s26   ;;  %s4161_s25 = sphi %s4229_s25, %s5607_s25   ;;  %s4157_s24 = sphi %s4227_s24, %s5606_s24  }
   0x4   : > { %s4252_s30 = sadd.s32 1, %s4169_s27   ;;  %s179_s8 = sadd.s32 1, %s4165_s26 }
   0x5   : > { %s176_s9 = ssub.s32 %s4169_s27, %s4252_s30  ;;  %p189_p0 = scmp.ne.s32.totalorder %s4165_s26, %s4161_s25 }
   0x6   : > { %p177_p1 = scmp.eq.s32.totalorder %s176_s9, 0  ;;  %p190_p2 = scmp.eq.s32.totalorder %s4248_s28, 1 }
   0x7   : > { %p195_p3 = scmp.ne.s32.totalorder %s4161_s25, %s4157_s24  ;;  %p196_p4 = scmp.eq.s32.totalorder %s3270_s29, 1 }
   0x8   : > { %s4263_s10 = scalar_select %p177_p1, %s4165_s26, %s179_s8  }
   0x9   : > { %p4265_p5 = por %p190_p2, %p189_p0  ;;  %p4269_p6 = por %p196_p4, %p195_p3 }
   0xa   : > { %p3273_p7 = scmp.ge.s32.totalorder %s4169_s27, 1  ;;  %p240_p8 = scmp.lt.s32.totalorder %s4169_s27, 3 }
   0xc   : > { %p241_p9 = pnand %p3273_p7, %p240_p8 }
   0xd   : > { %vm277_vm0 = vcmask (!%p241_p9), 31744   ;;  %vm279_vm1 = vcmask (!%p241_p9), 24576   ;;  %v4171_v0 = vmov (!%p241_p9), 0.0   ;;  %p272_p10 = scmp.lt.s32.totalorder (!%p241_p9), %s4248_s28, 1  ;;  %v4382_v1 = vld [vmem:[%s5597_s1] ss:$0 sm:$0xff] (!%p241_p9) }
   0xe   : > { %244 = sbr.rel (%p241_p9) target bundleno = 1158 (0x486), region = 48  ;;  %297 = vst.msk [vmem:[#allocation2 + $0x90] sm:$0xff] (!%p241_p9), %vm277_vm0, %v4171_v0  ;;  %278 = vst.msk [vmem:[#allocation2] sm:$0xff] (!%p241_p9), %vm277_vm0, %v4171_v0  ;;  %v4392_v2 = vld [vmem:[%s5598_s2] ss:$0 sm:$0xff] (!%p241_p9)  ;;  %s4172_s22 = smov (!%p241_p9), 4  }
   0xf   : > { %281 = vst.msk [vmem:[#allocation2 + $0x10] sm:$0xff] (!%p241_p9), %vm277_vm0, %v4171_v0  ;;  %283 = vst.msk [vmem:[#allocation2 + $0x20] sm:$0xff] (!%p241_p9), %vm277_vm0, %v4171_v0  ;;  %s4173_s23 = smov (!%p241_p9), 8   ;;  %s4174_s29 = smov (!%p241_p9), 12   ;;  %vm980_vm2 = vcmask (!%p241_p9), 1043456   ;;  %vm590_vm3 = vcmask (!%p241_p9), 64544  }
  0x10   : > { %285 = vst.msk [vmem:[#allocation2 + $0x30] sm:$0xff] (!%p241_p9), %vm277_vm0, %v4171_v0  ;;  %287 = vst.msk [vmem:[#allocation2 + $0x40] sm:$0xff] (!%p241_p9), %vm277_vm0, %v4171_v0  ;;  %s4175_s8 = smov (!%p241_p9), 16   ;;  %s4176_s9 = smov (!%p241_p9), 20   ;;  %vm639_vm4 = vcmask (!%p241_p9), 97344   ;;  %vm688_vm5 = vcmask (!%p241_p9), 130144  }
  0x11   : > { %289 = vst.msk [vmem:[#allocation2 + $0x50] sm:$0xff] (!%p241_p9), %vm277_vm0, %v4171_v0  ;;  %291 = vst.msk [vmem:[#allocation2 + $0x60] sm:$0xff] (!%p241_p9), %vm277_vm0, %v4171_v0  ;;  %vm737_vm6 = vcmask (!%p241_p9), 162944   ;;  %vm786_vm7 = vcmask (!%p241_p9), 195744   ;;  %vm835_vm8 = vcmask (!%p241_p9), 228544   ;;  %vm884_vm9 = vcmask (!%p241_p9), 261344  }
  0x12   : > { %293 = vst.msk [vmem:[#allocation2 + $0x70] sm:$0xff] (!%p241_p9), %vm277_vm0, %v4171_v0  ;;  %295 = vst.msk [vmem:[#allocation2 + $0x80] sm:$0xff] (!%p241_p9), %vm277_vm0, %v4171_v0  ;;  %vm933_vm10 = vcmask (!%p241_p9), 294144   ;;  %vm955_vm11 = vcmask (!%p241_p9), 293888   ;;  %vm1821_vm12 = vcmask (!%p241_p9), 64512   ;;  %vm1823_vm13 = vcmask (!%p241_p9), 58368  }
  0x13   : > { %299 = vst.msk [vmem:[#allocation2 + $0xa0] sm:$0xff] (!%p241_p9), %vm277_vm0, %v4171_v0  ;;  %301 = vst.msk [vmem:[#allocation2 + $0xb0] sm:$0xff] (!%p241_p9), %vm277_vm0, %v4171_v0  ;;  %vm1908_vm14 = vcmask (!%p241_p9), 130112   ;;  %vm1957_vm15 = vcmask (!%p241_p9), 195712   ;;  %s4182_s15 = smov (!%p241_p9), 40   ;;  %s4183_s17 = smov (!%p241_p9), 64  }
  0x14   : > { %303 = vst.msk [vmem:[#allocation2 + $0xc0] sm:$0xff] (!%p241_p9), %vm277_vm0, %v4171_v0  ;;  %305 = vst.msk [vmem:[#allocation2 + $0xd0] sm:$0xff] (!%p241_p9), %vm277_vm0, %v4171_v0 }
  0x15   : > { %307 = vst.msk [vmem:[#allocation2 + $0xe0] sm:$0xff] %vm277_vm0, %v4171_v0  ;;  %309 = vst.msk [vmem:[#allocation2 + $0xf0] sm:$0xff] %vm277_vm0, %v4171_v0  ;;  %s273_s13 = scalar_select %p272_p10, %s4248_s28, 1  ;;  %v550_v3 = vld [vmem:[#allocation2 + $0x90] sm:$0xff]  ;;  %v533_v9 = vld [vmem:[#allocation2] sm:$0xff] }
  0x16   : > { %311 = vst.msk [vmem:[#allocation2 + $0x100] sm:$0xff] %vm277_vm0, %v4171_v0  ;;  %313 = vst.msk [vmem:[#allocation2 + $0x110] sm:$0xff] %vm277_vm0, %v4171_v0  ;;  %566 = vrot.lane.b32.xlu0 %v550_v3, %s4172_s22 }
  0x17   : > { %315 = vst.msk [vmem:[#allocation2 + $0x120] sm:$0xff] %vm277_vm0, %v4171_v0  ;;  %317 = vst.msk [vmem:[#allocation2 + $0x130] sm:$0xff] %vm277_vm0, %v4171_v0  ;;  %s4052_s14 = smul.u32 576, %s273_s13  ;;  %s4177_s13 = smov 24  }
  0x18   : > { %319 = vst.msk [vmem:[#allocation2 + $0x140] sm:$0xff] %vm277_vm0, %v4171_v0  ;;  %321 = vst.msk [vmem:[#allocation2 + $0x150] sm:$0xff] %vm277_vm0, %v4171_v0 }
  0x19   : > { %323 = vst.msk [vmem:[#allocation2 + $0x160] sm:$0xff] %vm277_vm0, %v4171_v0  ;;  %325 = vst.msk [vmem:[#allocation2 + $0x170] sm:$0xff] %vm277_vm0, %v4171_v0  ;;  %s4387_s19 = scalar_lea.vmem %s5596_s0, %s4052_s14  ;;  %s4178_s14 = smov 28  }
  0x1a   : > { %327 = vst.msk [vmem:[#allocation2 + $0x180] sm:$0xff] %vm277_vm0, %v4171_v0  ;;  %329 = vst.msk [vmem:[#allocation2 + $0x190] sm:$0xff] %vm277_vm0, %v4171_v0  ;;  %v3286_v5 = vld [vmem:[%s4387_s19 + $0xa0] sm:$0xff]  ;;  %v3276_v7 = vld [vmem:[%s4387_s19 + $0x11] sm:$0xff] }
  0x1b   : > { %333 = vst.msk [vmem:[#allocation2 + $0x1b0] sm:$0xff] %vm277_vm0, %v4171_v0  ;;  %335 = vst.msk [vmem:[#allocation2 + $0x1c0] sm:$0xff] %vm277_vm0, %v4171_v0  ;;  %v416_v6 = vmul.f32 %v3286_v5, %v4382_v1  ;;  %v3294_v8 = vld [vmem:[%s4387_s19 + $0x121] sm:$0xff]  ;;  %v368_v10 = vmul.f32 %v4382_v1, %v3276_v7  ;;  %v3295_v12 = vld [vmem:[%s4387_s19 + $0x131] sm:$0xff] }
  0x1c   : > { %337 = vst.msk [vmem:[#allocation2 + $0x1d0] sm:$0xff] %vm277_vm0, %v4171_v0  ;;  %339 = vst.msk [vmem:[#allocation2 + $0x1e0] sm:$0xff] %vm277_vm0, %v4171_v0  ;;  %v458_v11 = vmul.f32 %v3294_v8, %v4382_v1  ;;  %v3302_v13 = vld [vmem:[%s4387_s19 + $0x1b0] sm:$0xff]  ;;  %v459_v16 = vmul.f32 %v3295_v12, %v4382_v1  ;;  %v3303_v19 = vld [vmem:[%s4387_s19 + $0x1c0] sm:$0xff] }
  0x1d   : > { %341 = vst.msk [vmem:[#allocation2 + $0x1f0] sm:$0xff] %vm277_vm0, %v4171_v0  ;;  %343 = vst.msk [vmem:[#allocation2 + $0x200] sm:$0xff] %vm277_vm0, %v4171_v0  ;;  %v3287_v14 = vld [vmem:[%s4387_s19 + $0xb0] sm:$0xff]  ;;  %v424_v15 = vadd.f32 %v4392_v2, %v416_v6  ;;  %v500_v17 = vmul.f32 %v3302_v13, %v4382_v1  ;;  %v3288_v20 = vld [vmem:[%s4387_s19 + $0xc0] sm:$0xff]  ;;  %v382_v21 = vadd.f32 %v4392_v2, %v368_v10 }
  0x1e   : > { %345 = vst.msk [vmem:[#allocation2 + $0x210] sm:$0xff] %vm277_vm0, %v4171_v0  ;;  %347 = vst.msk [vmem:[#allocation2 + $0x220] sm:$0xff] %vm277_vm0, %v4171_v0  ;;  %v417_v18 = vmul.f32 %v3287_v14, %v4382_v1  ;;  %v466_v22 = vadd.f32 %v4392_v2, %v458_v11  ;;  %v501_v23 = vmul.f32 %v3303_v19, %v4382_v1  ;;  %v3277_v25 = vld [vmem:[%s4387_s19 + $0x21] sm:$0xff]  ;;  %v3278_v30 = vld [vmem:[%s4387_s19 + $0x31] sm:$0xff] }
  0x1f   : > { %280 = vst.msk [vmem:[#allocation2 + $0x8] sm:$0x1] %vm279_vm1, %v4171_v0  ;;  %282 = vst.msk [vmem:[#allocation2 + $0x18] sm:$0x1] %vm279_vm1, %v4171_v0  ;;  %v418_v24 = vmul.f32 %v3288_v20, %v4382_v1  ;;  %v432_v26 = vmax.f32 %v424_v15, 0.0  ;;  %v467_v27 = vadd.f32 %v4392_v2, %v459_v16  ;;  %v508_v28 = vadd.f32 %v4392_v2, %v500_v17  ;;  %v3296_v31 = vld [vmem:[%s4387_s19 + $0x141] sm:$0xff] }
  0x20   : > { %284 = vst.msk [vmem:[#allocation2 + $0x28] sm:$0x1] %vm279_vm1, %v4171_v0  ;;  %286 = vst.msk [vmem:[#allocation2 + $0x38] sm:$0x1] %vm279_vm1, %v4171_v0  ;;  %v425_v29 = vadd.f32 %v4392_v2, %v417_v18  ;;  %v390_v32 = vmax.f32 %v382_v21, 0.0  ;;  %v474_v33 = vmax.f32 %v466_v22, 0.0  ;;  %v509_v34 = vadd.f32 %v4392_v2, %v501_v23 }
  0x21   : > { %288 = vst.msk [vmem:[#allocation2 + $0x48] sm:$0x1] %vm279_vm1, %v4171_v0  ;;  %290 = vst.msk [vmem:[#allocation2 + $0x58] sm:$0x1] %vm279_vm1, %v4171_v0  ;;  %v426_v35 = vadd.f32 %v4392_v2, %v418_v24  ;;  %v3297_v36 = vld [vmem:[%s4387_s19 + $0x151] sm:$0xff]  ;;  %v475_v39 = vmax.f32 %v467_v27, 0.0  ;;  %v369_v42 = vmul.f32 %v4382_v1, %v3277_v25  ;;  %v370_v47 = vmul.f32 %v4382_v1, %v3278_v30 }
  0x22   : > { %292 = vst.msk [vmem:[#allocation2 + $0x68] sm:$0x1] %vm279_vm1, %v4171_v0  ;;  %294 = vst.msk [vmem:[#allocation2 + $0x78] sm:$0x1] %vm279_vm1, %v4171_v0  ;;  %v3304_v37 = vld [vmem:[%s4387_s19 + $0x1d0] sm:$0xff]  ;;  %v516_v40 = vmax.f32 %v508_v28, 0.0  ;;  %v460_v48 = vmul.f32 %v3296_v31, %v4382_v1  ;;  %v461_v50 = vmul.f32 %v3297_v36, %v4382_v1 }
  0x23   : > { %296 = vst.msk [vmem:[#allocation2 + $0x88] sm:$0x1] %vm279_vm1, %v4171_v0  ;;  %316 = vst.msk [vmem:[#allocation2 + $0x128] sm:$0x1] %vm279_vm1, %v4171_v0  ;;  %v3289_v38 = vld [vmem:[%s4387_s19 + $0xd0] sm:$0xff]  ;;  %v433_v41 = vmax.f32 %v425_v29, 0.0  ;;  %v383_v49 = vadd.f32 %v4392_v2, %v369_v42  ;;  %v502_v51 = vmul.f32 %v3304_v37, %v4382_v1  ;;  %v384_v53 = vadd.f32 %v4392_v2, %v370_v47 }
  0x24   : > { %318 = vst.msk [vmem:[#allocation2 + $0x138] sm:$0x1] %vm279_vm1, %v4171_v0  ;;  %320 = vst.msk [vmem:[#allocation2 + $0x148] sm:$0x1] %vm279_vm1, %v4171_v0  ;;  %v3305_v43 = vld [vmem:[%s4387_s19 + $0x1e0] sm:$0xff]  ;;  %v517_v45 = vmax.f32 %v509_v34, 0.0  ;;  %v419_v52 = vmul.f32 %v3289_v38, %v4382_v1  ;;  %v468_v54 = vadd.f32 %v4392_v2, %v460_v48  ;;  %v469_v59 = vadd.f32 %v4392_v2, %v461_v50 }
  0x25   : > { %322 = vst.msk [vmem:[#allocation2 + $0x158] sm:$0x1] %vm279_vm1, %v4171_v0  ;;  %324 = vst.msk [vmem:[#allocation2 + $0x168] sm:$0x1] %vm279_vm1, %v4171_v0  ;;  %v3290_v44 = vld [vmem:[%s4387_s19 + $0xe0] sm:$0xff]  ;;  %v434_v46 = vmax.f32 %v426_v35, 0.0  ;;  %v503_v55 = vmul.f32 %v3305_v43, %v4382_v1  ;;  %v510_v60 = vadd.f32 %v4392_v2, %v502_v51 }
  0x26   : > { %326 = vst.msk [vmem:[#allocation2 + $0x178] sm:$0x1] %vm279_vm1, %v4171_v0  ;;  %328 = vst.msk [vmem:[#allocation2 + $0x188] sm:$0x1] %vm279_vm1, %v4171_v0  ;;  %v599_v4 = vld [vmem:[#allocation2 + $0x1] sm:$0xff]  ;;  %v420_v56 = vmul.f32 %v3290_v44, %v4382_v1  ;;  %v391_v58 = vmax.f32 %v383_v49, 0.0  ;;  %v427_v61 = vadd.f32 %v4392_v2, %v419_v52 }
  0x27   : > { %330 = vst.msk [vmem:[#allocation2 + $0x198] sm:$0x1] %vm279_vm1, %v4171_v0  ;;  %615 = vrot.lane.b32.xlu1 %v599_v4, %s4173_s23  ;;  %v3279_v57 = vld [vmem:[%s4387_s19 + $0x41] sm:$0xff]  ;;  %v3280_v62 = vld [vmem:[%s4387_s19 + $0x51] sm:$0xff]  ;;  %v392_v3 = vmax.f32 %v384_v53, 0.0  ;;  %v476_v4 = vmax.f32 %v468_v54, 0.0  ;;  %v511_v5 = vadd.f32 %v4392_v2, %v503_v55 }
  0x28   : > { %541 = vst.msk [vmem:[#allocation3] sm:$0xff] %vm277_vm0, %v533_v9  ;;  %441 = vst.msk [vmem:[#allocation2 + $0xa0] sm:$0xff] %vm277_vm0, %v432_v26  ;;  %v3298_v63 = vld [vmem:[%s4387_s19 + $0x161] sm:$0xff]  ;;  %v428_v6 = vadd.f32 %v4392_v2, %v420_v56  ;;  %v3299_v7 = vld [vmem:[%s4387_s19 + $0x171] sm:$0xff]  ;;  %v477_v10 = vmax.f32 %v469_v59, 0.0  ;;  %v518_v11 = vmax.f32 %v510_v60, 0.0  ;;  %v371_v13 = vmul.f32 %v4382_v1, %v3279_v57 }
  0x29   : > { %399 = vst.msk [vmem:[#allocation2 + $0x11] sm:$0xff] %vm277_vm0, %v390_v32  ;;  %483 = vst.msk [vmem:[#allocation2 + $0x121] sm:$0xff] %vm277_vm0, %v474_v33  ;;  %v3306_v8 = vld [vmem:[%s4387_s19 + $0x1f0] sm:$0xff]  ;;  %v435_v12 = vmax.f32 %v427_v61, 0.0  ;;  %v3307_v14 = vld [vmem:[%s4387_s19 + $0x200] sm:$0xff]  ;;  %v519_v17 = vmax.f32 %v511_v5, 0.0  ;;  %v372_v19 = vmul.f32 %v4382_v1, %v3280_v62  ;;  %v462_v20 = vmul.f32 %v3298_v63, %v4382_v1 }
  0x2a   : > { %484 = vst.msk [vmem:[#allocation2 + $0x131] sm:$0xff] %vm277_vm0, %v475_v39  ;;  %525 = vst.msk [vmem:[#allocation2 + $0x1b0] sm:$0xff] %vm277_vm0, %v516_v40  ;;  %v3291_v9 = vld [vmem:[%s4387_s19 + $0xf0] sm:$0xff]  ;;  %v3292_v15 = vld [vmem:[%s4387_s19 + $0x100] sm:$0xff]  ;;  %v436_v18 = vmax.f32 %v428_v6, 0.0  ;;  %v385_v22 = vadd.f32 %v4392_v2, %v371_v13  ;;  %v463_v23 = vmul.f32 %v3299_v7, %v4382_v1  ;;  %v504_v24 = vmul.f32 %v3306_v8, %v4382_v1 }
  0x2b   : > { %442 = vst.msk [vmem:[#allocation2 + $0xb0] sm:$0xff] %vm277_vm0, %v433_v41  ;;  %526 = vst.msk [vmem:[#allocation2 + $0x1c0] sm:$0xff] %vm277_vm0, %v517_v45  ;;  %v421_v25 = vmul.f32 %v3291_v9, %v4382_v1  ;;  %v386_v27 = vadd.f32 %v4392_v2, %v372_v19  ;;  %v470_v28 = vadd.f32 %v4392_v2, %v462_v20  ;;  %v3281_v31 = vld [vmem:[%s4387_s19 + $0x61] sm:$0xff]  ;;  %v3282_v32 = vld [vmem:[%s4387_s19 + $0x71] sm:$0xff]  ;;  %vm2055_vm1 = vcmask 326912  }
  0x2c   : > { %443 = vst.msk [vmem:[#allocation2 + $0xc0] sm:$0xff] %vm277_vm0, %v434_v46  ;;  %400 = vst.msk [vmem:[#allocation2 + $0x21] sm:$0xff] %vm277_vm0, %v391_v58  ;;  %v505_v29 = vmul.f32 %v3307_v14, %v4382_v1  ;;  %v422_v30 = vmul.f32 %v3292_v15, %v4382_v1  ;;  %v393_v34 = vmax.f32 %v385_v22, 0.0  ;;  %v471_v35 = vadd.f32 %v4392_v2, %v463_v23  ;;  %v3300_v38 = vld [vmem:[%s4387_s19 + $0x181] sm:$0xff]  ;;  %v3301_v39 = vld [vmem:[%s4387_s19 + $0x191] sm:$0xff] }
  0x2d   : > { %401 = vst.msk [vmem:[#allocation2 + $0x31] sm:$0xff] %vm277_vm0, %v392_v3  ;;  %485 = vst.msk [vmem:[#allocation2 + $0x141] sm:$0xff] %vm277_vm0, %v476_v4  ;;  %v512_v36 = vadd.f32 %v4392_v2, %v504_v24  ;;  %v429_v37 = vadd.f32 %v4392_v2, %v421_v25  ;;  %v394_v41 = vmax.f32 %v386_v27, 0.0  ;;  %v478_v42 = vmax.f32 %v470_v28, 0.0  ;;  %v3308_v45 = vld [vmem:[%s4387_s19 + $0x210] sm:$0xff]  ;;  %v3309_v46 = vld [vmem:[%s4387_s19 + $0x220] sm:$0xff] }
  0x2e   : > { %486 = vst.msk [vmem:[#allocation2 + $0x151] sm:$0xff] %vm277_vm0, %v477_v10  ;;  %527 = vst.msk [vmem:[#allocation2 + $0x1d0] sm:$0xff] %vm277_vm0, %v518_v11  ;;  %v513_v43 = vadd.f32 %v4392_v2, %v505_v29  ;;  %v430_v44 = vadd.f32 %v4392_v2, %v422_v30  ;;  %v479_v47 = vmax.f32 %v471_v35, 0.0  ;;  %v373_v50 = vmul.f32 %v4382_v1, %v3281_v31  ;;  %v3283_v51 = vld [vmem:[%s4387_s19 + $0x81] sm:$0xff]  ;;  %v3293_v52 = vld [vmem:[%s4387_s19 + $0x110] sm:$0xff]  ;;  %s4179_s19 = smov 32  }
  0x2f   : > { %v4463_v16 = vld [vmem:[#allocation2 + $0xa0] sm:$0xff]  ;;  %444 = vst.msk [vmem:[#allocation2 + $0xd0] sm:$0xff] %vm277_vm0, %v435_v12  ;;  %528 = vst.msk [vmem:[#allocation2 + $0x1e0] sm:$0xff] %vm277_vm0, %v519_v17  ;;  %v520_v48 = vmax.f32 %v512_v36, 0.0  ;;  %v437_v49 = vmax.f32 %v429_v37, 0.0  ;;  %v374_v57 = vmul.f32 %v4382_v1, %v3282_v32  ;;  %v464_v58 = vmul.f32 %v3300_v38, %v4382_v1  ;;  %v4596_v35 = vld [vmem:[%s5599_s3 + $0x8] sm:$0xff] }
  0x30   : > { %568 = vrot.lane.b32.xlu0 %v4463_v16, %s4172_s22  ;;  %v4471_v21 = vld [vmem:[#allocation2 + $0x11] sm:$0xff]  ;;  %v648_v26 = vld [vmem:[#allocation2 + $0x120] sm:$0xff]  ;;  %445 = vst.msk [vmem:[#allocation2 + $0xe0] sm:$0xff] %vm277_vm0, %v436_v18  ;;  %402 = vst.msk [vmem:[#allocation2 + $0x41] sm:$0xff] %vm277_vm0, %v393_v34  ;;  %v521_v55 = vmax.f32 %v513_v43, 0.0  ;;  %v438_v56 = vmax.f32 %v430_v44, 0.0  ;;  %v387_v60 = vadd.f32 %v4392_v2, %v373_v50  ;;  %v465_v61 = vmul.f32 %v3301_v39, %v4382_v1 }
  0x31   : > { %617 = vrot.lane.b32.xlu1 %v4471_v21, %s4173_s23  ;;  %v649_v33 = vld [vmem:[#allocation2 + $0x130] sm:$0xff]  ;;  %403 = vst.msk [vmem:[#allocation2 + $0x51] sm:$0xff] %vm277_vm0, %v394_v41  ;;  %487 = vst.msk [vmem:[#allocation2 + $0x161] sm:$0xff] %vm277_vm0, %v478_v42  ;;  %v506_v62 = vmul.f32 %v3308_v45, %v4382_v1  ;;  %v507_v63 = vmul.f32 %v3309_v46, %v4382_v1  ;;  %v388_v3 = vadd.f32 %v4392_v2, %v374_v57  ;;  %v746_v17 = vld [vmem:[#allocation2 + $0x121] sm:$0xff] }
  0x32   : > { %v4495_v40 = vld [vmem:[#allocation2 + $0x10] sm:$0xff]  ;;  %488 = vst.msk [vmem:[#allocation2 + $0x171] sm:$0xff] %vm277_vm0, %v479_v47  ;;  %529 = vst.msk [vmem:[#allocation2 + $0x1f0] sm:$0xff] %vm277_vm0, %v520_v48  ;;  %v472_v4 = vadd.f32 %v4392_v2, %v464_v58  ;;  %v375_v5 = vmul.f32 %v4382_v1, %v3283_v51  ;;  %v423_v6 = vmul.f32 %v3293_v52, %v4382_v1  ;;  %v395_v7 = vmax.f32 %v387_v60, 0.0  ;;  %v698_v11 = vld [vmem:[#allocation2 + $0x1c0] sm:$0xff] }
  0x33   : > { %542 = vst.msk [vmem:[#allocation3 + $0x8] sm:$0xff] %vm277_vm0, %v4495_v40  ;;  %v697_v53 = vld [vmem:[#allocation2 + $0x1b0] sm:$0xff]  ;;  %v4509_v54 = vld [vmem:[#allocation2 + $0x20] sm:$0xff]  ;;  %446 = vst.msk [vmem:[#allocation2 + $0xf0] sm:$0xff] %vm277_vm0, %v437_v49  ;;  %v473_v8 = vadd.f32 %v4392_v2, %v465_v61  ;;  %v514_v9 = vadd.f32 %v4392_v2, %v506_v62  ;;  %v515_v10 = vadd.f32 %v4392_v2, %v507_v63  ;;  %v396_v13 = vmax.f32 %v388_v3, 0.0 }
  0x34   : > { %664 = vrot.lane.b32.xlu0 %v648_v26, %s4174_s29  ;;  %v4515_v59 = vld [vmem:[#allocation2 + $0xb0] sm:$0xff]  ;;  %543 = vst.msk [vmem:[#allocation3 + $0x10] sm:$0xff] %vm277_vm0, %v4509_v54  ;;  %530 = vst.msk [vmem:[#allocation2 + $0x200] sm:$0xff] %vm277_vm0, %v521_v55  ;;  %v480_v14 = vmax.f32 %v472_v4, 0.0  ;;  %v389_v1 = vadd.f32 %v4392_v2, %v375_v5  ;;  %v431_v15 = vadd.f32 %v4392_v2, %v423_v6  ;;  %v4556_v2 = vld [vmem:[#allocation2 + $0xc0] sm:$0xff]  ;;  %v988_v37 = vand.u32 4294901760, %v4596_v35 }
  0x35   : > { %666 = vrot.lane.b32.xlu1 %v649_v33, %s4174_s29  ;;  %447 = vst.msk [vmem:[#allocation2 + $0x100] sm:$0xff] %vm277_vm0, %v438_v56  ;;  %v4538_v12 = vld [vmem:[#allocation2 + $0x30] sm:$0xff]  ;;  %404 = vst.msk [vmem:[#allocation2 + $0x61] sm:$0xff] %vm277_vm0, %v395_v7  ;;  %v481_v18 = vmax.f32 %v473_v8, 0.0  ;;  %v522_v19 = vmax.f32 %v514_v9, 0.0  ;;  %v523_v20 = vmax.f32 %v515_v10, 0.0 }
  0x36   : > { %544 = vst.msk [vmem:[#allocation3 + $0x18] sm:$0xff] %vm277_vm0, %v4538_v12  ;;  %405 = vst.msk [vmem:[#allocation2 + $0x71] sm:$0xff] %vm277_vm0, %v396_v13  ;;  %v397_v23 = vmax.f32 %v389_v1, 0.0  ;;  %v439_v24 = vmax.f32 %v431_v15, 0.0  ;;  %v601_v25 = vld [vmem:[#allocation2 + $0x21] sm:$0xff]  ;;  %v747_v27 = vld [vmem:[#allocation2 + $0x131] sm:$0xff] }
  0x37   : > { %v4545_v22 = vld [vmem:[#allocation2 + $0x40] sm:$0xff]  ;;  %489 = vst.msk [vmem:[#allocation2 + $0x181] sm:$0xff] %vm277_vm0, %v480_v14  ;;  %490 = vst.msk [vmem:[#allocation2 + $0x191] sm:$0xff] %vm277_vm0, %v481_v18  ;;  %v602_v30 = vld [vmem:[#allocation2 + $0x31] sm:$0xff] }
  0x38   : > { %713 = vrot.lane.b32.xlu0 %v697_v53, %s4175_s8  ;;  %531 = vst.msk [vmem:[#allocation2 + $0x210] sm:$0xff] %vm277_vm0, %v522_v19  ;;  %532 = vst.msk [vmem:[#allocation2 + $0x220] sm:$0xff] %vm277_vm0, %v523_v20  ;;  %v4560_v26 = vld [vmem:[#allocation2 + $0x50] sm:$0xff]  ;;  %v650_v31 = vld [vmem:[#allocation2 + $0x140] sm:$0xff] }
  0x39   : > { %570 = vrot.lane.b32.xlu1 %v4515_v59, %s4172_s22  ;;  %545 = vst.msk [vmem:[#allocation3 + $0x20] sm:$0xff] %vm277_vm0, %v4545_v22  ;;  %406 = vst.msk [vmem:[#allocation2 + $0x81] sm:$0xff] %vm277_vm0, %v397_v23  ;;  %v651_v32 = vld [vmem:[#allocation2 + $0x150] sm:$0xff]  ;;  %v4591_v34 = vld [vmem:[%s5599_s3] sm:$0xff] }
  0x3a   : > { %448 = vst.msk [vmem:[#allocation2 + $0x110] sm:$0xff] %vm277_vm0, %v439_v24  ;;  %546 = vst.msk [vmem:[#allocation3 + $0x28] sm:$0xff] %vm277_vm0, %v4560_v26  ;;  %v699_v33 = vld [vmem:[#allocation2 + $0x1d0] sm:$0xff]  ;;  %v985_v36 = vand.u32 4294901760, %v4591_v34  ;;  %v700_v38 = vld [vmem:[#allocation2 + $0x1e0] sm:$0xff] }
  0x3b   : > { %v748_v41 = vld [vmem:[#allocation2 + $0x141] sm:$0xff]  ;;  %v749_v50 = vld [vmem:[#allocation2 + $0x151] sm:$0xff]  ;;  %1827 = vst.msk [vmem:[#allocation4 + $0x20] sm:$0xff] %vm1821_vm12, %v4171_v0  ;;  %1822 = vst.msk [vmem:[#allocation4] sm:$0xff] %vm1821_vm12, %v4171_v0 }
  0x3c   : > { %715 = vrot.lane.b32.xlu0 %v698_v11, %s4175_s8  ;;  %v4567_v28 = vld [vmem:[#allocation2 + $0x60] sm:$0xff]  ;;  %v4606_v39 = vpack.c.bf16 %v988_v37, %v985_v36  ;;  %v604_v51 = vld [vmem:[#allocation2 + $0x51] sm:$0xff]  ;;  %v4688_v10 = vsub.f32 %v4591_v34, %v985_v36  ;;  %v4693_v11 = vsub.f32 %v4596_v35, %v988_v37  ;;  %1828 = vst.msk [vmem:[#allocation4 + $0x28] sm:$0x3] %vm1823_vm13, %v4171_v0  ;;  %1824 = vst.msk [vmem:[#allocation4 + $0x8] sm:$0x3] %vm1823_vm13, %v4171_v0 }
  0x3d   : > { %762 = vrot.lane.b32.xlu1 %v746_v17, %s4176_s9  ;;  %547 = vst.msk [vmem:[#allocation3 + $0x30] sm:$0xff] %vm277_vm0, %v4567_v28  ;;  %v4572_v29 = vld [vmem:[#allocation2 + $0x70] sm:$0xff]  ;;  %v555_v45 = vld [vmem:[#allocation2 + $0xe0] sm:$0xff] }
  0x3e   : > { %548 = vst.msk [vmem:[#allocation3 + $0x38] sm:$0xff] %vm277_vm0, %v4572_v29  ;;  %3811 = vmatprep.subr.bf16.mxu0 %v4606_v39  ;;  %v954_v46 = vld [vmem:[%s5599_s3 + $0x20] sm:$0xf]  ;;  %v653_v53 = vld [vmem:[#allocation2 + $0x170] sm:$0xff]  ;;  %v1137_v14 = vand.u32 4294901760, %v4688_v10  ;;  %v1144_v1 = vand.u32 4294901760, %v4693_v11 }
  0x3f   : > { %3813 = vmatpush3.bf16.msra.mxu0 %v4606_v39  ;;  %v603_v47 = vld [vmem:[#allocation2 + $0x41] sm:$0xff]  ;;  %v4637_v48 = vsel %vm980_vm2, %v954_v46, 0  ;;  %v556_v55 = vld [vmem:[#allocation2 + $0xf0] sm:$0xff]  ;;  %1825 = vst.msk [vmem:[#allocation4 + $0x10] sm:$0xff] %vm1821_vm12, %v4171_v0  ;;  %1829 = vst.msk [vmem:[#allocation4 + $0x30] sm:$0xff] %vm1821_vm12, %v4171_v0  ;;  %vm2006_vm0 = vcmask 261312  }
  0x40   : > { %572 = vrot.lane.b32.xlu0 %v4556_v2, %s4172_s22  ;;  %v4640_v49 = vand.u32 4294901760, %v4637_v48  ;;  %v652_v52 = vld [vmem:[#allocation2 + $0x160] sm:$0xff]  ;;  %v751_v60 = vld [vmem:[#allocation2 + $0x171] sm:$0xff]  ;;  %v1138_v17 = vsub.f32 %v4688_v10, %v1137_v14  ;;  %v1145_v18 = vsub.f32 %v4693_v11, %v1144_v1  ;;  %1826 = vst.msk [vmem:[#allocation4 + $0x18] sm:$0x3] %vm1823_vm13, %v4171_v0  ;;  %vm2104_vm2 = vcmask 392512  }
  0x41   : > { %619 = vrot.lane.b32.xlu1 %v601_v25, %s4173_s23  ;;  %v702_v56 = vld [vmem:[#allocation2 + $0x200] sm:$0xff]  ;;  %v606_v61 = vld [vmem:[#allocation2 + $0x71] sm:$0xff]  ;;  %1830 = vst.msk [vmem:[#allocation4 + $0x38] sm:$0x3] %vm1823_vm13, %v4171_v0  ;;  %1832 = vst.msk [vmem:[#allocation4 + $0x48] sm:$0x3] %vm1823_vm13, %v4171_v0 }
  0x42   : > { %v750_v57 = vld [vmem:[#allocation2 + $0x161] sm:$0xff]  ;;  %v655_v63 = vld [vmem:[#allocation2 + $0x190] sm:$0xff]  ;;  %v1146_v23 = vand.u32 4294901760, %v1145_v18  ;;  %1831 = vst.msk [vmem:[#allocation4 + $0x40] sm:$0xff] %vm1821_vm12, %v4171_v0  ;;  %1833 = vst.msk [vmem:[#allocation4 + $0x50] sm:$0xff] %vm1821_vm12, %v4171_v0 }
  0x43   : > { %v557_v58 = vld [vmem:[#allocation2 + $0x100] sm:$0xff]  ;;  %v703_v3 = vld [vmem:[#allocation2 + $0x210] sm:$0xff]  ;;  %1834 = vst.msk [vmem:[#allocation4 + $0x58] sm:$0x3] %vm1823_vm13, %v4171_v0  ;;  %1836 = vst.msk [vmem:[#allocation4 + $0x68] sm:$0x3] %vm1823_vm13, %v4171_v0 }
  0x44   : > { %764 = vrot.lane.b32.xlu0 %v747_v27, %s4176_s9  ;;  %v654_v62 = vld [vmem:[#allocation2 + $0x180] sm:$0xff]  ;;  %v753_v8 = vld [vmem:[#allocation2 + $0x191] sm:$0xff]  ;;  %1835 = vst.msk [vmem:[#allocation4 + $0x60] sm:$0xff] %vm1821_vm12, %v4171_v0  ;;  %1837 = vst.msk [vmem:[#allocation4 + $0x70] sm:$0xff] %vm1821_vm12, %v4171_v0 }
  0x45   : > { %811 = vrot.lane.b32.xlu1 %v4495_v40, %s4177_s13  ;;  %v4612_v40 = vld [vmem:[%s5599_s3 + $0x10] sm:$0xff]  ;;  %v704_v6 = vld [vmem:[#allocation2 + $0x220] sm:$0xff]  ;;  %1838 = vst.msk [vmem:[#allocation4 + $0x78] sm:$0x3] %vm1823_vm13, %v4171_v0  ;;  %1840 = vst.msk [vmem:[#allocation4 + $0x88] sm:$0x3] %vm1823_vm13, %v4171_v0 }
  0x46   : > { %v991_v42 = vand.u32 4294901760, %v4612_v40  ;;  %v752_v7 = vld [vmem:[#allocation2 + $0x181] sm:$0xff]  ;;  %v851_v13 = vld [vmem:[#allocation2 + $0x110] sm:$0xff]  ;;  %1839 = vst.msk [vmem:[#allocation4 + $0x80] sm:$0xff] %vm1821_vm12, %v4171_v0  ;;  %1841 = vst.msk [vmem:[#allocation4 + $0x90] sm:$0xff] %vm1821_vm12, %v4171_v0 }
  0x47   : > { %v802_v9 = vld [vmem:[#allocation2 + $0x80] sm:$0xff]  ;;  %1842 = vst.msk [vmem:[#allocation4 + $0x98] sm:$0x3] %vm1823_vm13, %v4171_v0 }
  0x48   : > { %621 = vrot.lane.b32.xlu0 %v602_v30, %s4173_s23  ;;  %v900_v20 = vld [vmem:[#allocation2 + $0x81] sm:$0xff]  ;;  %v3310_v0 = vld [vmem:[%s5600_s4] ss:$0 sm:$0xff] }
  0x49   : > { %668 = vrot.lane.b32.xlu1 %v650_v31, %s4174_s29  ;;  %v4723_v31 = vpack.c.bf16 %v4693_v11, %v4688_v10  ;;  %v4774_v10 = vsub.f32 %v4637_v48, %v4640_v49 }
  0x4c   : > { %813 = vrot.lane.b32.xlu0 %v4509_v54, %s4177_s13  ;;  %v701_v54 = vld [vmem:[#allocation2 + $0x1f0] sm:$0xff] }
  0x4d   : > { %860 = vrot.lane.b32.xlu1 %v4463_v16, %s4178_s14  ;;  %v554_v16 = vld [vmem:[#allocation2 + $0xd0] sm:$0xff] }
  0x50   : > { %670 = vrot.lane.b32.xlu0 %v651_v32, %s4174_s29 }
  0x51   : > { %717 = vrot.lane.b32.xlu1 %v699_v33, %s4175_s8  ;;  %v1150_v33 = vsub.f32 %v4612_v40, %v991_v42 }
  0x54   : > { %862 = vrot.lane.b32.xlu0 %v4515_v59, %s4178_s14  ;;  %v605_v59 = vld [vmem:[#allocation2 + $0x61] sm:$0xff] }
  0x55   : > { %909 = vrot.lane.b32.xlu1 %v4471_v21, %s4179_s19  ;;  %v4617_v21 = vld [vmem:[%s5599_s3 + $0x18] sm:$0xff] }
  0x56   : > { %v994_v43 = vand.u32 4294901760, %v4617_v21 }
  0x58   : > { %574 = vrot.lane.b32.xlu0 %v554_v16, %s4172_s22  ;;  %v4628_v44 = vpack.c.bf16 %v994_v43, %v991_v42  ;;  %v1157_v34 = vsub.f32 %v4617_v21, %v994_v43 }
  0x59   : > { %719 = vrot.lane.b32.xlu1 %v700_v38, %s4175_s8 }
  0x5a   : > { %3815 = vmatprep.subr.bf16.mxu0 %v4628_v44 }
  0x5b   : > { %3817 = vmatpush3.bf16.msra.mxu0 %v4628_v44 }
  0x5c   : > { %766 = vrot.lane.b32.xlu0 %v748_v41, %s4176_s9  ;;  %3506 = vmatprep.subr.mxu0 %v4640_v49 }
  0x5d   : > { %911 = vrot.lane.b32.xlu1 %v601_v25, %s4179_s19 }
  0x5f   : > { %3507 = vmatpush3.msra.mxu0 %v4640_v49 }
  0x60   : > { %576 = vrot.lane.b32.xlu0 %v555_v45, %s4172_s22 }
  0x61   : > { %623 = vrot.lane.b32.xlu1 %v603_v47, %s4173_s23 }
  0x64   : > { %768 = vrot.lane.b32.xlu0 %v749_v50, %s4176_s9 }
  0x65   : > { %815 = vrot.lane.b32.xlu1 %v4538_v12, %s4177_s13 }
  0x68   : > { %625 = vrot.lane.b32.xlu0 %v604_v51, %s4173_s23 }
  0x69   : > { %672 = vrot.lane.b32.xlu1 %v652_v52, %s4174_s29 }
  0x6c   : > { %817 = vrot.lane.b32.xlu0 %v4545_v22, %s4177_s13  ;;  %v1139_v22 = vand.u32 4294901760, %v1138_v17  ;;  %v4783_v17 = vand.u32 4294901760, %v4774_v10 }
  0x6d   : > { %864 = vrot.lane.b32.xlu1 %v4556_v2, %s4178_s14 }
  0x6e   : > { %v4711_v2 = vpack.c.bf16 %v1146_v23, %v1139_v22  ;;  %v1166_v23 = vsub.f32 %v4774_v10, %v4783_v17 }
  0x70   : > { %674 = vrot.lane.b32.xlu0 %v653_v53, %s4174_s29  ;;  %3819 = vmatprep.subr.bf16.mxu0 %v4711_v2 }
  0x71   : > { %721 = vrot.lane.b32.xlu1 %v701_v54, %s4175_s8 }
  0x74   : > { %866 = vrot.lane.b32.xlu0 %v554_v16, %s4178_s14  ;;  %v4733_v16 = vpack.c.bf16 %v1157_v34, %v1150_v33 }
  0x75   : > { %913 = vrot.lane.b32.xlu1 %v602_v30, %s4179_s19 }
  0x78   : > { %578 = vrot.lane.b32.xlu0 %v556_v55, %s4172_s22 }
  0x79   : > { %723 = vrot.lane.b32.xlu1 %v702_v56, %s4175_s8 }
  0x7c   : > { %770 = vrot.lane.b32.xlu0 %v750_v57, %s4176_s9  ;;  %v1151_v57 = vand.u32 4294901760, %v1150_v33 }
  0x7d   : > { %915 = vrot.lane.b32.xlu1 %v603_v47, %s4179_s19 }
  0x80   : > { %580 = vrot.lane.b32.xlu0 %v557_v58, %s4172_s22  ;;  %s4180_s22 = smov 48  }
  0x81   : > { %627 = vrot.lane.b32.xlu1 %v605_v59, %s4173_s23 }
  0x84   : > { %772 = vrot.lane.b32.xlu0 %v751_v60, %s4176_s9  ;;  %v1158_v60 = vand.u32 4294901760, %v1157_v34 }
  0x85   : > { %819 = vrot.lane.b32.xlu1 %v4560_v26, %s4177_s13 }
  0x88   : > { %629 = vrot.lane.b32.xlu0 %v606_v61, %s4173_s23  ;;  %v567_v4 = vpop.permute.xlu0 %566 }
  0x89   : > { %676 = vrot.lane.b32.xlu1 %v654_v62, %s4174_s29  ;;  %591 = vst.msk [vmem:[#allocation3] sm:$0xff] %vm590_vm3, %v567_v4 }
  0x8c   : > { %821 = vrot.lane.b32.xlu0 %v4567_v28, %s4177_s13 }
  0x8d   : > { %868 = vrot.lane.b32.xlu1 %v555_v45, %s4178_s14 }
  0x90   : > { %678 = vrot.lane.b32.xlu0 %v655_v63, %s4174_s29  ;;  %s4181_s29 = smov 56  }
  0x91   : > { %725 = vrot.lane.b32.xlu1 %v703_v3, %s4175_s8 }
  0x94   : > { %870 = vrot.lane.b32.xlu0 %v556_v55, %s4178_s14 }
  0x95   : > { %917 = vrot.lane.b32.xlu1 %v604_v51, %s4179_s19 }
  0x98   : > { %727 = vrot.lane.b32.xlu0 %v704_v6, %s4175_s8  ;;  %v4768_v6 = vpack.c.bf16 %v1158_v60, %v1151_v57 }
  0x99   : > { %v616_v5 = vpop.permute.xlu1 %615  ;;  %774 = vrot.lane.b32.xlu1 %v752_v7, %s4176_s9 }
  0x9a   : > { %640 = vst.msk [vmem:[#allocation3] sm:$0xff] %vm639_vm4, %v616_v5  ;;  %v1152_v5 = vsub.f32 %v1150_v33, %v1151_v57 }
  0x9c   : > { %919 = vrot.lane.b32.xlu0 %v605_v59, %s4179_s19 }
  0x9d   : > { %776 = vrot.lane.b32.xlu1 %v753_v8, %s4176_s9  ;;  %s4185_s9 = smov [#allocation6]  }
  0xa0   : > { %823 = vrot.lane.b32.xlu0 %v4572_v29, %s4177_s13 }
  0xa1   : > { %825 = vrot.lane.b32.xlu1 %v802_v9, %s4177_s13  ;;  %v1159_v9 = vsub.f32 %v1157_v34, %v1158_v60 }
  0xa2   : > { %v569_v12 = vpop.permute.xlu0 %568 }
  0xa3   : > { %592 = vst.msk [vmem:[#allocation3 + $0x8] sm:$0xff] %vm590_vm3, %v569_v12  ;;  %v618_v15 = vpop.permute.xlu1 %617 }
  0xa4   : > { %641 = vst.msk [vmem:[#allocation3 + $0x8] sm:$0xff] %vm639_vm4, %v618_v15  ;;  %872 = vrot.lane.b32.xlu0 %v557_v58, %s4178_s14  ;;  %v4759_v58 = vpack.c.bf16 %v1144_v1, %v1137_v14  ;;  %v1153_v1 = vand.u32 4294901760, %v1152_v5  ;;  %v1160_v15 = vand.u32 4294901760, %v1159_v9 }
  0xa5   : > { %874 = vrot.lane.b32.xlu1 %v851_v13, %s4178_s14  ;;  %s4111_s14 = sshll.u32 %s4185_s9, 4  ;;  %s4112_s14 = int_to_ptr.vmem [resolvable:$false] %s4111_s14 }
  0xa6   : > { %v665_v19 = vpop.permute.xlu0 %664  ;;  %v3822_v22 = vpack.c.bf16 %v1160_v15, %v1153_v1  ;;  %s4113_s20 = scalar_lea.vmem %s4112_s14, 2048 }
  0xa7   : > { %689 = vst.msk [vmem:[#allocation3] sm:$0xff] %vm688_vm5, %v665_v19  ;;  %v667_v24 = vpop.permute.xlu1 %666 }
  0xa8   : > { %690 = vst.msk [vmem:[#allocation3 + $0x8] sm:$0xff] %vm688_vm5, %v667_v24  ;;  %921 = vrot.lane.b32.xlu0 %v606_v61, %s4179_s19 }
  0xa9   : > { %923 = vrot.lane.b32.xlu1 %v900_v20, %s4179_s19 }
  0xaa   : > { %v714_v25 = vpop.permute.xlu0 %713 }
  0xab   : > { %738 = vst.msk [vmem:[#allocation3] sm:$0xff] %vm737_vm6, %v714_v25  ;;  %v571_v26 = vpop.permute.xlu1 %570 }
  0xac   : > { %593 = vst.msk [vmem:[#allocation3 + $0x10] sm:$0xff] %vm590_vm3, %v571_v26  ;;  %v1167_v26 = vand.u32 4294901760, %v1166_v23 }
  0xae   : > { %v716_v27 = vpop.permute.xlu0 %715 }
  0xaf   : > { %739 = vst.msk [vmem:[#allocation3 + $0x8] sm:$0xff] %vm737_vm6, %v716_v27  ;;  %v763_v28 = vpop.permute.xlu1 %762 }
  0xb0   : > { %787 = vst.msk [vmem:[#allocation3] sm:$0xff] %vm786_vm7, %v763_v28 }
  0xb2   : > { %v573_v29 = vpop.permute.xlu0 %572 }
  0xb3   : > { %594 = vst.msk [vmem:[#allocation3 + $0x18] sm:$0xff] %vm590_vm3, %v573_v29  ;;  %v620_v30 = vpop.permute.xlu1 %619 }
  0xb4   : > { %642 = vst.msk [vmem:[#allocation3 + $0x10] sm:$0xff] %vm639_vm4, %v620_v30 }
  0xb6   : > { %v765_v32 = vpop.permute.xlu0 %764 }
  0xb7   : > { %788 = vst.msk [vmem:[#allocation3 + $0x8] sm:$0xff] %vm786_vm7, %v765_v32  ;;  %v812_v35 = vpop.permute.xlu1 %811 }
  0xb8   : > { %836 = vst.msk [vmem:[#allocation3] sm:$0xff] %vm835_vm8, %v812_v35 }
  0xba   : > { %v622_v36 = vpop.permute.xlu0 %621 }
  0xbb   : > { %643 = vst.msk [vmem:[#allocation3 + $0x18] sm:$0xff] %vm639_vm4, %v622_v36  ;;  %v669_v37 = vpop.permute.xlu1 %668 }
  0xbc   : > { %691 = vst.msk [vmem:[#allocation3 + $0x10] sm:$0xff] %vm688_vm5, %v669_v37 }
  0xbe   : > { %v814_v38 = vpop.permute.xlu0 %813 }
  0xbf   : > { %837 = vst.msk [vmem:[#allocation3 + $0x8] sm:$0xff] %vm835_vm8, %v814_v38  ;;  %v861_v40 = vpop.permute.xlu1 %860 }
  0xc0   : > { %885 = vst.msk [vmem:[#allocation3] sm:$0xff] %vm884_vm9, %v861_v40 }
  0xc2   : > { %v671_v21 = vpop.permute.xlu0 %670 }
  0xc3   : > { %692 = vst.msk [vmem:[#allocation3 + $0x18] sm:$0xff] %vm688_vm5, %v671_v21  ;;  %v718_v41 = vpop.permute.xlu1 %717 }
  0xc4   : > { %740 = vst.msk [vmem:[#allocation3 + $0x10] sm:$0xff] %vm737_vm6, %v718_v41 }
  0xc6   : > { %v863_v42 = vpop.permute.xlu0 %862 }
  0xc7   : > { %886 = vst.msk [vmem:[#allocation3 + $0x8] sm:$0xff] %vm884_vm9, %v863_v42  ;;  %v910_v43 = vpop.permute.xlu1 %909 }
  0xc8   : > { %934 = vst.msk [vmem:[#allocation3] sm:$0xff] %vm933_vm10, %v910_v43 }
  0xca   : > { %v575_v45 = vpop.permute.xlu0 %574 }
  0xcb   : > { %595 = vst.msk [vmem:[#allocation3 + $0x20] sm:$0xff] %vm590_vm3, %v575_v45  ;;  %v720_v46 = vpop.permute.xlu1 %719 }
  0xcc   : > { %741 = vst.msk [vmem:[#allocation3 + $0x18] sm:$0xff] %vm737_vm6, %v720_v46 }
  0xce   : > { %v767_v47 = vpop.permute.xlu0 %766 }
  0xcf   : > { %789 = vst.msk [vmem:[#allocation3 + $0x10] sm:$0xff] %vm786_vm7, %v767_v47  ;;  %v912_v50 = vpop.permute.xlu1 %911  ;;  %v942_v51 = vld [vmem:[#allocation3] sm:$0xff] }
  0xd0   : > { %935 = vst.msk [vmem:[#allocation3 + $0x8] sm:$0xff] %vm933_vm10, %v912_v50  ;;  %v957_v52 = vsel %vm955_vm11, %v942_v51, 0 }
  0xd1   : > { %v4748_v53 = vand.u32 4294901760, %v957_v52 }
  0xd2   : > { %v577_v54 = vpop.permute.xlu0 %576 }
  0xd3   : > { %596 = vst.msk [vmem:[#allocation3 + $0x28] sm:$0xff] %vm590_vm3, %v577_v54  ;;  %v624_v55 = vpop.permute.xlu1 %623  ;;  %v4752_v56 = vsub.f32 %v957_v52, %v4748_v53 }
  0xd4   : > { %644 = vst.msk [vmem:[#allocation3 + $0x20] sm:$0xff] %vm639_vm4, %v624_v55 }
  0xd5   : > { %v1056_v59 = vand.u32 4294901760, %v4752_v56 }
  0xd6   : > { %v769_v61 = vpop.permute.xlu0 %768 }
  0xd7   : > { %790 = vst.msk [vmem:[#allocation3 + $0x18] sm:$0xff] %vm786_vm7, %v769_v61  ;;  %v816_v62 = vpop.permute.xlu1 %815  ;;  %v1057_v63 = vsub.f32 %v4752_v56, %v1056_v59  ;;  %v943_v3 = vld [vmem:[#allocation3 + $0x8] sm:$0xff] }
  0xd8   : > { %838 = vst.msk [vmem:[#allocation3 + $0x10] sm:$0xff] %vm835_vm8, %v816_v62  ;;  %v960_v4 = vsel %vm955_vm11, %v943_v3, 0 }
  0xd9   : > { %v1058_v7 = vand.u32 4294901760, %v1057_v63  ;;  %v4770_v8 = vand.u32 4294901760, %v960_v4 }
  0xda   : > { %v626_v11 = vpop.permute.xlu0 %625 }
  0xdb   : > { %645 = vst.msk [vmem:[#allocation3 + $0x28] sm:$0xff] %vm639_vm4, %v626_v11  ;;  %3508 = vmatprep.mubr.f32.mxu0 %v1058_v7  ;;  %v673_v12 = vpop.permute.xlu1 %672  ;;  %v4778_v13 = vsub.f32 %v960_v4, %v4770_v8 }
  0xdc   : > { %693 = vst.msk [vmem:[#allocation3 + $0x20] sm:$0xff] %vm688_vm5, %v673_v12 }
  0xdd   : > { %v1066_v14 = vand.u32 4294901760, %v4778_v13 }
  0xde   : > { %v818_v18 = vpop.permute.xlu0 %817 }
  0xdf   : > { %839 = vst.msk [vmem:[#allocation3 + $0x18] sm:$0xff] %vm835_vm8, %v818_v18  ;;  %v865_v48 = vpop.permute.xlu1 %864  ;;  %v1067_v19 = vsub.f32 %v4778_v13, %v1066_v14 }
  0xe0   : > { %887 = vst.msk [vmem:[#allocation3 + $0x10] sm:$0xff] %vm884_vm9, %v865_v48 }
  0xe1   : > { %v1068_v20 = vand.u32 4294901760, %v1067_v19 }
  0xe2   : > { %v675_v24 = vpop.permute.xlu0 %674 }
  0xe3   : > { %694 = vst.msk [vmem:[#allocation3 + $0x28] sm:$0xff] %vm688_vm5, %v675_v24  ;;  %v722_v25 = vpop.permute.xlu1 %721  ;;  %3509 = vmatmul.mubr.f32.vlgmr.msra.gmra.mrb[0].mxu0 %v1068_v20 }
  0xe4   : > { %742 = vst.msk [vmem:[#allocation3 + $0x20] sm:$0xff] %vm737_vm6, %v722_v25  ;;  %3821 = vmatpush3.bf16.msra.mxu0 %v4711_v2 }
  0xe5   : > { %3823 = vmatprep.subr.bf16.mxu0 %v3822_v22 }
  0xe6   : > { %v867_v27 = vpop.permute.xlu0 %866 }
  0xe7   : > { %888 = vst.msk [vmem:[#allocation3 + $0x18] sm:$0xff] %vm884_vm9, %v867_v27  ;;  %v914_v28 = vpop.permute.xlu1 %913 }
  0xe8   : > { %936 = vst.msk [vmem:[#allocation3 + $0x10] sm:$0xff] %vm933_vm10, %v914_v28  ;;  %3825 = vmatpush3.bf16.msra.mxu0 %v3822_v22 }
  0xe9   : > { %3528 = vmatprep.subr.mxu0 %v1167_v26 }
  0xea   : > { %v579_v29 = vpop.permute.xlu0 %578 }
  0xeb   : > { %597 = vst.msk [vmem:[#allocation3 + $0x30] sm:$0xff] %vm590_vm3, %v579_v29  ;;  %v724_v30 = vpop.permute.xlu1 %723 }
  0xec   : > { %743 = vst.msk [vmem:[#allocation3 + $0x28] sm:$0xff] %vm737_vm6, %v724_v30  ;;  %3529 = vmatpush3.msra.mxu0 %v1167_v26 }
  0xed   : > { %3827 = vmatprep.subr.bf16.mxu0 %v4723_v31 }
  0xee   : > { %v771_v2 = vpop.permute.xlu0 %770 }
  0xef   : > { %791 = vst.msk [vmem:[#allocation3 + $0x20] sm:$0xff] %vm786_vm7, %v771_v2  ;;  %v916_v32 = vpop.permute.xlu1 %915  ;;  %v944_v33 = vld [vmem:[#allocation3 + $0x10] sm:$0xff] }
  0xf0   : > { %937 = vst.msk [vmem:[#allocation3 + $0x18] sm:$0xff] %vm933_vm10, %v916_v32  ;;  %v963_v34 = vsel %vm955_vm11, %v944_v33, 0 }
  0xf1   : > { %v4803_v35 = vand.u32 4294901760, %v963_v34 }
  0xf2   : > { %v581_v36 = vpop.permute.xlu0 %580 }
  0xf3   : > { %598 = vst.msk [vmem:[#allocation3 + $0x38] sm:$0xff] %vm590_vm3, %v581_v36  ;;  %v628_v37 = vpop.permute.xlu1 %627  ;;  %v4807_v38 = vsub.f32 %v963_v34, %v4803_v35  ;;  %vm2154_vm3 = vcmask 458112  }
  0xf4   : > { %646 = vst.msk [vmem:[#allocation3 + $0x30] sm:$0xff] %vm639_vm4, %v628_v37 }
  0xf5   : > { %v1076_v40 = vand.u32 4294901760, %v4807_v38 }
  0xf6   : > { %v773_v21 = vpop.permute.xlu0 %772 }
  0xf7   : > { %792 = vst.msk [vmem:[#allocation3 + $0x28] sm:$0xff] %vm786_vm7, %v773_v21  ;;  %v820_v41 = vpop.permute.xlu1 %819  ;;  %v1077_v42 = vsub.f32 %v4807_v38, %v1076_v40  ;;  %v945_v43 = vld [vmem:[#allocation3 + $0x18] sm:$0xff] }
  0xf8   : > { %840 = vst.msk [vmem:[#allocation3 + $0x20] sm:$0xff] %vm835_vm8, %v820_v41  ;;  %v966_v45 = vsel %vm955_vm11, %v945_v43, 0 }
  0xf9   : > { %v1078_v46 = vand.u32 4294901760, %v1077_v42  ;;  %v4817_v47 = vand.u32 4294901760, %v966_v45 }
  0xfa   : > { %v630_v50 = vpop.permute.xlu0 %629 }
  0xfb   : > { %647 = vst.msk [vmem:[#allocation3 + $0x38] sm:$0xff] %vm639_vm4, %v630_v50  ;;  %v677_v51 = vpop.permute.xlu1 %676  ;;  %3511 = vmatprep.mubr.f32.mxu0 %v1078_v46  ;;  %v4821_v52 = vsub.f32 %v966_v45, %v4817_v47  ;;  %vm2203_vm4 = vcmask 523712  }
  0xfc   : > { %695 = vst.msk [vmem:[#allocation3 + $0x30] sm:$0xff] %vm688_vm5, %v677_v51 }
  0xfd   : > { %v1086_v54 = vand.u32 4294901760, %v4821_v52 }
  0xfe   : > { %v822_v55 = vpop.permute.xlu0 %821 }
  0xff   : > { %841 = vst.msk [vmem:[#allocation3 + $0x28] sm:$0xff] %vm835_vm8, %v822_v55  ;;  %v869_v57 = vpop.permute.xlu1 %868  ;;  %v1087_v60 = vsub.f32 %v4821_v52, %v1086_v54 }
 0x100   : > { %889 = vst.msk [vmem:[#allocation3 + $0x20] sm:$0xff] %vm884_vm9, %v869_v57 }
 0x101   : > { %v1088_v61 = vand.u32 4294901760, %v1087_v60 }
 0x102   : > { %v679_v62 = vpop.permute.xlu0 %678 }
 0x103   : > { %696 = vst.msk [vmem:[#allocation3 + $0x38] sm:$0xff] %vm688_vm5, %v679_v62  ;;  %v726_v63 = vpop.permute.xlu1 %725  ;;  %3512 = vmatmul.mubr.f32.gmra.mrb[2].mxu0 %v1088_v61  ;;  %vm2252_vm5 = vcmask 589312  }
 0x104   : > { %744 = vst.msk [vmem:[#allocation3 + $0x30] sm:$0xff] %vm737_vm6, %v726_v63 }
 0x106   : > { %v871_v3 = vpop.permute.xlu0 %870 }
 0x107   : > { %890 = vst.msk [vmem:[#allocation3 + $0x28] sm:$0xff] %vm884_vm9, %v871_v3  ;;  %v918_v4 = vpop.permute.xlu1 %917 }
 0x108   : > { %938 = vst.msk [vmem:[#allocation3 + $0x20] sm:$0xff] %vm933_vm10, %v918_v4 }
 0x10a   : > { %v728_v5 = vpop.permute.xlu0 %727 }
 0x10b   : > { %745 = vst.msk [vmem:[#allocation3 + $0x38] sm:$0xff] %vm737_vm6, %v728_v5  ;;  %v775_v7 = vpop.permute.xlu1 %774  ;;  %vm2310_vm6 = vcmask 588800  }
 0x10c   : > { %793 = vst.msk [vmem:[#allocation3 + $0x30] sm:$0xff] %vm786_vm7, %v775_v7 }
 0x10e   : > { %v920_v9 = vpop.permute.xlu0 %919 }
 0x10f   : > { %939 = vst.msk [vmem:[#allocation3 + $0x28] sm:$0xff] %vm933_vm10, %v920_v9  ;;  %v777_v11 = vpop.permute.xlu1 %776  ;;  %v946_v12 = vld [vmem:[#allocation3 + $0x20] sm:$0xff] }
 0x110   : > { %794 = vst.msk [vmem:[#allocation3 + $0x38] sm:$0xff] %vm786_vm7, %v777_v11  ;;  %v969_v1 = vsel %vm955_vm11, %v946_v12, 0 }
 0x111   : > { %v4839_v15 = vand.u32 4294901760, %v969_v1 }
 0x112   : > { %v824_v18 = vpop.permute.xlu0 %823 }
 0x113   : > { %842 = vst.msk [vmem:[#allocation3 + $0x30] sm:$0xff] %vm835_vm8, %v824_v18  ;;  %v826_v48 = vpop.permute.xlu1 %825  ;;  %v4843_v19 = vsub.f32 %v969_v1, %v4839_v15 }
 0x114   : > { %843 = vst.msk [vmem:[#allocation3 + $0x38] sm:$0xff] %vm835_vm8, %v826_v48 }
 0x115   : > { %v1096_v20 = vand.u32 4294901760, %v4843_v19 }
 0x116   : > { %v873_v22 = vpop.permute.xlu0 %872  ;;  %v947_v23 = vld [vmem:[#allocation3 + $0x28] sm:$0xff] }
 0x117   : > { %891 = vst.msk [vmem:[#allocation3 + $0x30] sm:$0xff] %vm884_vm9, %v873_v22  ;;  %v875_v24 = vpop.permute.xlu1 %874  ;;  %v1097_v25 = vsub.f32 %v4843_v19, %v1096_v20  ;;  %v972_v26 = vsel %vm955_vm11, %v947_v23, 0 }
 0x118   : > { %892 = vst.msk [vmem:[#allocation3 + $0x38] sm:$0xff] %vm884_vm9, %v875_v24  ;;  %v4853_v27 = vand.u32 4294901760, %v972_v26 }
 0x119   : > { %v1098_v28 = vand.u32 4294901760, %v1097_v25 }
 0x11a   : > { %v922_v29 = vpop.permute.xlu0 %921  ;;  %v1105_v30 = vsub.f32 %v972_v26, %v4853_v27 }
 0x11b   : > { %940 = vst.msk [vmem:[#allocation3 + $0x30] sm:$0xff] %vm933_vm10, %v922_v29  ;;  %v924_v2 = vpop.permute.xlu1 %923  ;;  %3514 = vmatprep.mubr.f32.mxu0 %v1098_v28 }
 0x11c   : > { %941 = vst.msk [vmem:[#allocation3 + $0x38] sm:$0xff] %vm933_vm10, %v924_v2  ;;  %v1106_v32 = vand.u32 4294901760, %v1105_v30 }
 0x11e   : > { %v1107_v33 = vsub.f32 %v1105_v30, %v1106_v32 }
 0x120   : > { %v1108_v34 = vand.u32 4294901760, %v1107_v33 }
 0x122   : > { %3515 = vmatmul.mubr.f32.gmra.mrb[4].mxu0 %v1108_v34  ;;  %v948_v36 = vld [vmem:[#allocation3 + $0x30] sm:$0xff] }
 0x123   : > { %v975_v37 = vsel %vm955_vm11, %v948_v36, 0  ;;  %v949_v21 = vld [vmem:[#allocation3 + $0x38] sm:$0xff] }
 0x124   : > { %v4859_v41 = vand.u32 4294901760, %v975_v37  ;;  %v978_v42 = vsel %vm955_vm11, %v949_v21, 0 }
 0x125   : > { %v4862_v43 = vand.u32 4294901760, %v978_v42 }
 0x126   : > { %v1115_v45 = vsub.f32 %v975_v37, %v4859_v41 }
 0x127   : > { %v1125_v46 = vsub.f32 %v978_v42, %v4862_v43  ;;  %v5056_v42 = vld [vmem:[%s5602_s6 + $0x8] sm:$0xff] }
 0x128   : > { %v1116_v50 = vand.u32 4294901760, %v1115_v45 }
 0x129   : > { %v1126_v51 = vand.u32 4294901760, %v1125_v46 }
 0x12a   : > { %v1117_v55 = vsub.f32 %v1115_v45, %v1116_v50 }
 0x12b   : > { %v1127_v57 = vsub.f32 %v1125_v46, %v1126_v51 }
 0x12c   : > { %v1118_v60 = vand.u32 4294901760, %v1117_v55  ;;  %v5076_v55 = vld [vmem:[%s5602_s6 + $0x18] sm:$0xff] }
 0x12d   : > { %v1128_v61 = vand.u32 4294901760, %v1127_v57 }
 0x12e   : > { %3517 = vmatprep.mubr.f32.mxu0 %v1118_v60  ;;  %v2345_v60 = vand.u32 4294901760, %v5076_v55 }
 0x12f   : > { %3518 = vmatmul.mubr.f32.gmra.mrb[6].mxu0 %v1128_v61 }
 0x130   : > { %3530 = vmatprep.mubr.f32.mxu0 %v4748_v53 }
 0x133   : > { %3531 = vmatmul.mubr.f32.vlgmr.msra.gmra.mrb[0].mxu0 %v4770_v8 }
 0x134   : > { %3533 = vmatprep.mubr.f32.mxu0 %v4803_v35  ;;  %3829 = vmatpush3.bf16.msra.mxu0 %v4723_v31  ;;  %v2170_v31 = vld [vmem:[#allocation4 + $0x91] sm:$0xff] }
 0x135   : > { %3831 = vmatprep.subr.bf16.mxu0 %v4733_v16 }
 0x137   : > { %3534 = vmatmul.mubr.f32.gmra.mrb[2].mxu0 %v4817_v47 }
 0x138   : > { %3536 = vmatprep.mubr.f32.mxu0 %v4839_v15  ;;  %3833 = vmatpush3.bf16.msra.mxu0 %v4733_v16  ;;  %v1852_v16 = vld [vmem:[#allocation4] sm:$0xff] }
 0x139   : > { %3550 = vmatprep.subr.mxu0 %v4774_v10  ;;  %1860 = vst.msk [vmem:[#allocation5] sm:$0xff] %vm1821_vm12, %v1852_v16 }
 0x13b   : > { %3537 = vmatmul.mubr.f32.gmra.mrb[4].mxu0 %v4853_v27 }
 0x13c   : > { %3539 = vmatprep.mubr.f32.mxu0 %v4859_v41  ;;  %3551 = vmatpush3.msra.mxu0 %v4774_v10 }
 0x13d   : > { %3835 = vmatprep.subr.bf16.mxu0 %v4606_v39 }
 0x13f   : > { %3540 = vmatmul.mubr.f32.gmra.mrb[6].mxu0 %v4862_v43 }
 0x140   : > { %3552 = vmatprep.mubr.f32.mxu0 %v4752_v56 }
 0x143   : > { %3553 = vmatmul.mubr.f32.vlgmr.msra.gmra.mrb[0].mxu0 %v4778_v13 }
 0x144   : > { %3555 = vmatprep.mubr.f32.mxu0 %v4807_v38  ;;  %3837 = vmatpush3.bf16.msra.mxu0 %v4606_v39 }
 0x145   : > { %3839 = vmatprep.subr.bf16.mxu0 %v4628_v44 }
 0x147   : > { %3556 = vmatmul.mubr.f32.gmra.mrb[2].mxu0 %v4821_v52 }
 0x148   : > { %3558 = vmatprep.mubr.f32.mxu0 %v4843_v19  ;;  %3841 = vmatpush3.bf16.msra.mxu0 %v4628_v44 }
 0x149   : > { %3572 = vmatprep.subr.mxu0 %v4640_v49 }
 0x14b   : > { %3559 = vmatmul.mubr.f32.gmra.mrb[4].mxu0 %v1105_v30 }
 0x14c   : > { %3561 = vmatprep.mubr.f32.mxu0 %v1115_v45  ;;  %3573 = vmatpush3.msra.mxu0 %v4640_v49  ;;  %v2339_v45 = vand.u32 4294901760, %v5056_v42 }
 0x14d   : > { %3843 = vmatprep.subr.bf16.mxu0 %v4759_v58 }
 0x14f   : > { %3562 = vmatmul.mubr.f32.gmra.mrb[6].mxu0 %v1125_v46 }
 0x150   : > { %3574 = vmatprep.mubr.f32.mxu0 %v1056_v59  ;;  %v3311_v59 = vld [vmem:[%s5601_s5] ss:$0 sm:$0xff] }
 0x153   : > { %3575 = vmatmul.mubr.f32.vlgmr.msra.gmra.mrb[0].mxu0 %v1066_v14 }
 0x154   : > { %3577 = vmatprep.mubr.f32.mxu0 %v1076_v40  ;;  %3845 = vmatpush3.bf16.msra.mxu0 %v4759_v58 }
 0x155   : > { %3847 = vmatprep.subr.bf16.mxu0 %v4768_v6 }
 0x157   : > { %3578 = vmatmul.mubr.f32.gmra.mrb[2].mxu0 %v1086_v54 }
 0x158   : > { %3580 = vmatprep.mubr.f32.mxu0 %v1096_v20  ;;  %3849 = vmatpush3.bf16.msra.mxu0 %v4768_v6 }
 0x159   : > { %3594 = vmatprep.subr.mxu0 %v4783_v17 }
 0x15b   : > { %3581 = vmatmul.mubr.f32.gmra.mrb[4].mxu0 %v1106_v32 }
 0x15c   : > { %3583 = vmatprep.mubr.f32.mxu0 %v1116_v50  ;;  %3595 = vmatpush3.msra.mxu0 %v4783_v17 }
 0x15d   : > { %3851 = vmatprep.subr.bf16.mxu0 %v4606_v39 }
 0x15f   : > { %3584 = vmatmul.mubr.f32.gmra.mrb[6].mxu0 %v1126_v51  ;;  %v5071_v51 = vld [vmem:[%s5602_s6 + $0x10] sm:$0xff] }
 0x160   : > { %3596 = vmatprep.mubr.f32.mxu0 %v4748_v53  ;;  %v2342_v57 = vand.u32 4294901760, %v5071_v51 }
 0x162   : > { %v5088_v61 = vpack.c.bf16 %v2345_v60, %v2342_v57 }
 0x163   : > { %3597 = vmatmul.mubr.f32.vlgmr.msra.gmra.mrb[0].mxu0 %v4770_v8 }
 0x164   : > { %3599 = vmatprep.mubr.f32.mxu0 %v4803_v35  ;;  %3853 = vmatpush3.bf16.msra.mxu0 %v4606_v39  ;;  %v1868_v39 = vld [vmem:[#allocation4 + $0x1] sm:$0xff] }
 0x165   : > { %3855 = vmatprep.subr.bf16.mxu0 %v4628_v44  ;;  %1884 = vrot.lane.b32.xlu0 %v1868_v39, %s4173_s23  ;;  %v5096_v39 = vld [vmem:[%s5602_s6 + $0x20] sm:$0xff] }
 0x167   : > { %3600 = vmatmul.mubr.f32.gmra.mrb[2].mxu0 %v4817_v47 }
 0x168   : > { %3602 = vmatprep.mubr.f32.mxu0 %v4839_v15  ;;  %3857 = vmatpush3.bf16.msra.mxu0 %v4628_v44  ;;  %v2121_v44 = vld [vmem:[#allocation4 + $0x90] sm:$0xff] }
 0x169   : > { %3616 = vmatprep.subr.mxu0 %v4640_v49  ;;  %2144 = vrot.lane.b32.xlu1 %v2121_v44, %s4180_s22  ;;  %v5101_v44 = vld [vmem:[%s5602_s6 + $0x28] sm:$0xff] }
 0x16b   : > { %3603 = vmatmul.mubr.f32.gmra.mrb[4].mxu0 %v4853_v27 }
 0x16c   : > { %3605 = vmatprep.mubr.f32.mxu0 %v4859_v41  ;;  %3617 = vmatpush3.msra.mxu0 %v4640_v49  ;;  %v1917_v49 = vld [vmem:[#allocation4 + $0x2] sm:$0xff] }
 0x16d   : > { %1933 = vrot.lane.b32.xlu0 %v1917_v49, %s4175_s8  ;;  %2193 = vrot.lane.b32.xlu1 %v2170_v31, %s4181_s29  ;;  %v2348_v49 = vand.u32 4294901760, %v5096_v39  ;;  %v2351_v31 = vand.u32 4294901760, %v5101_v44 }
 0x16f   : > { %3606 = vmatmul.mubr.f32.gmra.mrb[6].mxu0 %v4862_v43 }
 0x170   : > { %3618 = vmatprep.mubr.f32.mxu0 %v4748_v53 }
 0x173   : > { %3619 = vmatmul.mubr.f32.vlgmr.msra.gmra.mrb[0].mxu0 %v4770_v8 }
 0x174   : > { %3621 = vmatprep.mubr.f32.mxu0 %v4803_v35 }
 0x177   : > { %3622 = vmatmul.mubr.f32.gmra.mrb[2].mxu0 %v4817_v47 }
 0x178   : > { %3624 = vmatprep.mubr.f32.mxu0 %v4839_v15 }
 0x17b   : > { %3625 = vmatmul.mubr.f32.gmra.mrb[4].mxu0 %v4853_v27 }
 0x17c   : > { %3627 = vmatprep.mubr.f32.mxu0 %v4859_v41  ;;  %v5051_v41 = vld [vmem:[%s5602_s6] sm:$0xff] }
 0x17f   : > { %3628 = vmatmul.mubr.f32.gmra.mrb[6].mxu0 %v4862_v43  ;;  %v2336_v43 = vand.u32 4294901760, %v5051_v41 }
 0x181   : > { %v5064_v50 = vpack.c.bf16 %v2339_v45, %v2336_v43 }
 0x183   : > { %3939 = vmatprep.subr.bf16.mxu0 %v5064_v50  ;;  %3859 = vmatprep.subr.bf16.mxu1 %v5064_v50 }
 0x184   : > { %3941 = vmatpush3.bf16.msra.mxu0 %v5064_v50  ;;  %3861 = vmatpush3.bf16.msra.mxu1 %v5064_v50 }
 0x185   : > { %3943 = vmatprep.subr.bf16.mxu0 %v5088_v61  ;;  %3863 = vmatprep.subr.bf16.mxu1 %v5088_v61 }
 0x188   : > { %3945 = vmatpush3.bf16.msra.mxu0 %v5088_v61  ;;  %3865 = vmatpush3.bf16.msra.mxu1 %v5088_v61 }
 0x1d7   : > { %v1885_v53 = vpop.permute.xlu0 %1884 }
 0x1d8   : > { %1909 = vst.msk [vmem:[#allocation5] sm:$0xff] %vm1908_vm14, %v1885_v53  ;;  %v5113_v53 = vpack.c.bf16 %v2351_v31, %v2348_v49 }
 0x1da   : > { %3947 = vmatprep.subr.bf16.mxu0 %v5113_v53  ;;  %3867 = vmatprep.subr.bf16.mxu1 %v5113_v53 }
 0x1db   : > { %3949 = vmatpush3.bf16.msra.mxu0 %v5113_v53  ;;  %3869 = vmatpush3.bf16.msra.mxu1 %v5113_v53 }
 0x1df   : > { %v1934_v56 = vpop.permute.xlu0 %1933 }
 0x1e0   : > { %1958 = vst.msk [vmem:[#allocation5] sm:$0xff] %vm1957_vm15, %v1934_v56  ;;  %v5125_v56 = vld [vmem:[%s5602_s6 + $0x38] sm:$0xff] }
 0x246   : > { %v4978_v58 = vpop.f32.mrb[0].mxu0 }
 0x247   : > { %v1792_v6 = vmul.f32 %v4978_v58, %v3310_v0  ;;  %v4984_v8 = vpop.f32.mrb[1].mxu0 }
 0x248   : > { %v1791_v10 = vmul.f32 %v3310_v0, %v4984_v8 }
 0x249   : > { %v1806_v13 = vadd.f32 %v3311_v59, %v1792_v6  ;;  %v2357_v6 = vand.u32 4294901760, %v5125_v56 }
 0x24a   : > { %v1805_v14 = vadd.f32 %v3311_v59, %v1791_v10  ;;  %v4987_v17 = vpop.f32.mrb[2].mxu0 }
 0x24b   : > { %v1814_v35 = vmax.f32 %v1806_v13, 0.0  ;;  %v1794_v38 = vmul.f32 %v4987_v17, %v3310_v0  ;;  %v4990_v40 = vpop.f32.mrb[3].mxu0  ;;  %v5147_v13 = vld [vmem:[%s5602_s6 + $0x40] sm:$0xff] }
 0x24c   : > { %v1813_v47 = vmax.f32 %v1805_v14, 0.0  ;;  %v1793_v52 = vmul.f32 %v3310_v0, %v4990_v40 }
 0x24d   : > { %1845 = vst.msk [vmem:[#allocation4 + $0x21] sm:$0xff] %vm1821_vm12, %v1814_v35  ;;  %v1808_v54 = vadd.f32 %v3311_v59, %v1794_v38  ;;  %v5151_v35 = vand.u32 4294901760, %v5147_v13 }
 0x24e   : > { %1844 = vst.msk [vmem:[#allocation4 + $0x11] sm:$0xff] %vm1821_vm12, %v1813_v47  ;;  %v1807_v62 = vadd.f32 %v3311_v59, %v1793_v52  ;;  %v4995_v63 = vpop.f32.mrb[4].mxu0 }
 0x24f   : > { %v1816_v3 = vmax.f32 %v1808_v54, 0.0  ;;  %v1796_v4 = vmul.f32 %v4995_v63, %v3310_v0  ;;  %v4998_v5 = vpop.f32.mrb[5].mxu0 }
 0x250   : > { %v1815_v7 = vmax.f32 %v1807_v62, 0.0  ;;  %v1795_v9 = vmul.f32 %v3310_v0, %v4998_v5 }
 0x251   : > { %1847 = vst.msk [vmem:[#allocation4 + $0x41] sm:$0xff] %vm1821_vm12, %v1816_v3  ;;  %v1810_v11 = vadd.f32 %v3311_v59, %v1796_v4 }
 0x252   : > { %1846 = vst.msk [vmem:[#allocation4 + $0x31] sm:$0xff] %vm1821_vm12, %v1815_v7  ;;  %v1809_v12 = vadd.f32 %v3311_v59, %v1795_v9  ;;  %v5003_v1 = vpop.f32.mrb[6].mxu0 }
 0x253   : > { %v1818_v15 = vmax.f32 %v1810_v11, 0.0  ;;  %v1798_v18 = vmul.f32 %v5003_v1, %v3310_v0  ;;  %v5006_v48 = vpop.f32.mrb[7].mxu0  ;;  %v5201_v11 = vsub.f32 %v5051_v41, %v2336_v43  ;;  %v5267_v41 = vsub.f32 %v5096_v39, %v2348_v49 }
 0x254   : > { %v1817_v19 = vmax.f32 %v1809_v12, 0.0  ;;  %v1797_v20 = vmul.f32 %v3310_v0, %v5006_v48  ;;  %v2114_v22 = vld [vmem:[#allocation4 + $0x20] sm:$0xff]  ;;  %v5120_v0 = vld [vmem:[%s5602_s6 + $0x30] sm:$0xff]  ;;  %v5206_v12 = vsub.f32 %v5056_v42, %v2339_v45 }
 0x255   : > { %1849 = vst.msk [vmem:[#allocation4 + $0x61] sm:$0xff] %vm1821_vm12, %v1818_v15  ;;  %v1812_v23 = vadd.f32 %v3311_v59, %v1798_v18  ;;  %2130 = vrot.lane.b32.xlu0 %v2114_v22, %s4180_s22  ;;  %1984 = vrot.lane.b32.xlu1 %v2114_v22, %s4177_s13  ;;  %v1966_v24 = vld [vmem:[#allocation4 + $0x10] sm:$0xff]  ;;  %1862 = vst.msk [vmem:[#allocation5 + $0x10] sm:$0xff] %vm1821_vm12, %v2114_v22  ;;  %v2016_v28 = vld [vmem:[#allocation4 + $0x21] sm:$0xff]  ;;  %v2492_v15 = vand.u32 4294901760, %v5201_v11 }
 0x256   : > { %1848 = vst.msk [vmem:[#allocation4 + $0x51] sm:$0xff] %vm1821_vm12, %v1817_v19  ;;  %v1811_v25 = vadd.f32 %v3311_v59, %v1797_v20  ;;  %1861 = vst.msk [vmem:[#allocation5 + $0x8] sm:$0xff] %vm1821_vm12, %v1966_v24  ;;  %v2065_v2 = vld [vmem:[#allocation4 + $0x22] sm:$0xff]  ;;  %v2015_v32 = vld [vmem:[#allocation4 + $0x11] sm:$0xff]  ;;  %v2354_v59 = vand.u32 4294901760, %v5120_v0  ;;  %v2499_v18 = vand.u32 4294901760, %v5206_v12  ;;  %v5212_v19 = vpop.permute.xlu1 %2144 }
 0x257   : > { %v1820_v26 = vmax.f32 %v1812_v23, 0.0  ;;  %v2064_v36 = vld [vmem:[#allocation4 + $0x12] sm:$0xff]  ;;  %v2493_v20 = vsub.f32 %v5201_v11, %v2492_v15 }
 0x258   : > { %v1819_v27 = vmax.f32 %v1811_v25, 0.0  ;;  %v5015_v29 = vld [vmem:[#allocation4 + $0x40] sm:$0xff]  ;;  %v5137_v10 = vpack.c.bf16 %v2357_v6, %v2354_v59  ;;  %v2500_v22 = vsub.f32 %v5206_v12, %v2499_v18  ;;  %v5284_v45 = vsub.f32 %v5120_v0, %v2354_v59 }
 0x259   : > { %1851 = vst.msk [vmem:[#allocation4 + $0x81] sm:$0xff] %vm1821_vm12, %v1820_v26  ;;  %2033 = vrot.lane.b32.xlu1 %v2016_v28, %s4179_s19  ;;  %1982 = vrot.lane.b32.xlu0 %v1966_v24, %s4177_s13  ;;  %v5020_v30 = vld [vmem:[#allocation4 + $0x30] sm:$0xff]  ;;  %1864 = vst.msk [vmem:[#allocation5 + $0x20] sm:$0xff] %vm1821_vm12, %v5015_v29  ;;  %v5043_v21 = vld [vmem:[#allocation4 + $0x41] sm:$0xff]  ;;  %v2494_v23 = vand.u32 4294901760, %v2493_v20 }
 0x25a   : > { %1850 = vst.msk [vmem:[#allocation4 + $0x71] sm:$0xff] %vm1821_vm12, %v1819_v27  ;;  %1863 = vst.msk [vmem:[#allocation5 + $0x18] sm:$0xff] %vm1821_vm12, %v5020_v30  ;;  %v2067_v46 = vld [vmem:[#allocation4 + $0x42] sm:$0xff]  ;;  %v1871_v16 = vld [vmem:[#allocation4 + $0x31] sm:$0xff]  ;;  %3951 = vmatprep.subr.bf16.mxu0 %v5137_v10  ;;  %3871 = vmatprep.subr.bf16.mxu1 %v5137_v10  ;;  %v2501_v24 = vand.u32 4294901760, %v2500_v22  ;;  %v5228_v26 = vpop.permute.xlu1 %2193 }
 0x25b   : > { %3953 = vmatpush3.bf16.msra.mxu0 %v5137_v10  ;;  %3873 = vmatpush3.bf16.msra.mxu1 %v5137_v10  ;;  %v1920_v14 = vld [vmem:[#allocation4 + $0x32] sm:$0xff] }
 0x25c   : > { %v5027_v33 = vld [vmem:[#allocation4 + $0x60] sm:$0xff]  ;;  %3796 = vmatprep.subr.mxu0 %v5151_v35  ;;  %3646 = vmatprep.subr.mxu1 %v5151_v35  ;;  %v5224_v25 = vpack.c.bf16 %v2501_v24, %v2494_v23  ;;  %v2219_v27 = vld [vmem:[#allocation4 + $0x92] sm:$0xff] }
 0x25d   : > { %2082 = vrot.lane.b32.xlu1 %v2065_v2, %s4182_s15  ;;  %2031 = vrot.lane.b32.xlu0 %v2015_v32, %s4179_s19  ;;  %v5031_v34 = vld [vmem:[#allocation4 + $0x50] sm:$0xff]  ;;  %1866 = vst.msk [vmem:[#allocation5 + $0x30] sm:$0xff] %vm1821_vm12, %v5027_v33  ;;  %v1874_v38 = vld [vmem:[#allocation4 + $0x61] sm:$0xff] }
 0x25e   : > { %1865 = vst.msk [vmem:[#allocation5 + $0x28] sm:$0xff] %vm1821_vm12, %v5031_v34  ;;  %v2069_v47 = vld [vmem:[#allocation4 + $0x62] sm:$0xff]  ;;  %v1873_v52 = vld [vmem:[#allocation4 + $0x51] sm:$0xff] }
 0x25f   : > { %3797 = vmatpush3.msra.mxu0 %v5151_v35  ;;  %3647 = vmatpush3.msra.mxu1 %v5151_v35  ;;  %v1922_v54 = vld [vmem:[#allocation4 + $0x52] sm:$0xff] }
 0x260   : > { %v1973_v62 = vld [vmem:[#allocation4 + $0x80] sm:$0xff]  ;;  %3875 = vmatprep.subr.bf16.mxu1 %v5224_v25 }
 0x261   : > { %1888 = vrot.lane.b32.xlu1 %v2016_v28, %s4173_s23  ;;  %2080 = vrot.lane.b32.xlu0 %v2064_v36, %s4182_s15  ;;  %v5039_v37 = vld [vmem:[#allocation4 + $0x70] sm:$0xff]  ;;  %v2022_v3 = vld [vmem:[#allocation4 + $0x81] sm:$0xff] }
 0x262   : > { %1867 = vst.msk [vmem:[#allocation5 + $0x38] sm:$0xff] %vm1821_vm12, %v5039_v37  ;;  %v1875_v4 = vld [vmem:[#allocation4 + $0x71] sm:$0xff]  ;;  %v2071_v7 = vld [vmem:[#allocation4 + $0x82] sm:$0xff] }
 0x263   : > { %v1924_v9 = vld [vmem:[#allocation4 + $0x72] sm:$0xff] }
 0x265   : > { %2179 = vrot.lane.b32.xlu1 %v2016_v28, %s4181_s29  ;;  %2037 = vrot.lane.b32.xlu0 %v5043_v21, %s4179_s19 }
 0x269   : > { %1937 = vrot.lane.b32.xlu1 %v2065_v2, %s4175_s8  ;;  %2086 = vrot.lane.b32.xlu0 %v2067_v46, %s4182_s15 }
 0x26d   : > { %2228 = vrot.lane.b32.xlu1 %v2065_v2, %s4183_s17  ;;  %2132 = vrot.lane.b32.xlu0 %v5020_v30, %s4180_s22 }
 0x271   : > { %1886 = vrot.lane.b32.xlu1 %v2015_v32, %s4173_s23  ;;  %1890 = vrot.lane.b32.xlu0 %v1871_v16, %s4173_s23 }
 0x275   : > { %1935 = vrot.lane.b32.xlu1 %v2064_v36, %s4175_s8  ;;  %2181 = vrot.lane.b32.xlu0 %v1871_v16, %s4181_s29 }
 0x279   : > { %1988 = vrot.lane.b32.xlu1 %v5015_v29, %s4177_s13  ;;  %1939 = vrot.lane.b32.xlu0 %v1920_v14, %s4175_s8 }
 0x27d   : > { %1892 = vrot.lane.b32.xlu1 %v5043_v21, %s4173_s23  ;;  %2230 = vrot.lane.b32.xlu0 %v1920_v14, %s4183_s17 }
 0x281   : > { %1941 = vrot.lane.b32.xlu1 %v2067_v46, %s4175_s8  ;;  %2035 = vrot.lane.b32.xlu0 %v1871_v16, %s4179_s19 }
 0x285   : > { %2134 = vrot.lane.b32.xlu1 %v5015_v29, %s4180_s22  ;;  %1992 = vrot.lane.b32.xlu0 %v5027_v33, %s4177_s13 }
 0x289   : > { %2183 = vrot.lane.b32.xlu1 %v5043_v21, %s4181_s29  ;;  %1896 = vrot.lane.b32.xlu0 %v1874_v38, %s4173_s23 }
 0x28d   : > { %2232 = vrot.lane.b32.xlu1 %v2067_v46, %s4183_s17  ;;  %2090 = vrot.lane.b32.xlu0 %v2069_v47, %s4182_s15  ;;  %v5289_v46 = vsub.f32 %v5125_v56, %v2357_v6 }
 0x291   : > { %1986 = vrot.lane.b32.xlu1 %v5020_v30, %s4177_s13  ;;  %1894 = vrot.lane.b32.xlu0 %v1873_v52, %s4173_s23 }
 0x295   : > { %2084 = vrot.lane.b32.xlu1 %v1920_v14, %s4182_s15  ;;  %1943 = vrot.lane.b32.xlu0 %v1922_v54, %s4175_s8 }
 0x299   : > { %2041 = vrot.lane.b32.xlu1 %v1874_v38, %s4179_s19  ;;  %2136 = vrot.lane.b32.xlu0 %v5031_v34, %s4180_s22 }
 0x29d   : > { %1945 = vrot.lane.b32.xlu1 %v2069_v47, %s4175_s8  ;;  %2185 = vrot.lane.b32.xlu0 %v1873_v52, %s4181_s29 }
 0x2a1   : > { %2138 = vrot.lane.b32.xlu1 %v5027_v33, %s4180_s22  ;;  %2088 = vrot.lane.b32.xlu0 %v1922_v54, %s4182_s15 }
 0x2a5   : > { %2187 = vrot.lane.b32.xlu1 %v1874_v38, %s4181_s29  ;;  %1996 = vrot.lane.b32.xlu0 %v1973_v62, %s4177_s13 }
 0x2a9   : > { %2236 = vrot.lane.b32.xlu1 %v2069_v47, %s4183_s17  ;;  %2045 = vrot.lane.b32.xlu0 %v2022_v3, %s4179_s19 }
 0x2ad   : > { %1990 = vrot.lane.b32.xlu1 %v5031_v34, %s4177_s13  ;;  %2142 = vrot.lane.b32.xlu0 %v1973_v62, %s4180_s22  ;;  %v5243_v34 = vpack.c.bf16 %v5206_v12, %v5201_v11 }
 0x2b1   : > { %2039 = vrot.lane.b32.xlu1 %v1873_v52, %s4179_s19  ;;  %2191 = vrot.lane.b32.xlu0 %v2022_v3, %s4181_s29 }
 0x2b5   : > { %2234 = vrot.lane.b32.xlu1 %v1922_v54, %s4183_s17  ;;  %1898 = vrot.lane.b32.xlu0 %v1875_v4, %s4173_s23 }
 0x2b9   : > { %2094 = vrot.lane.b32.xlu1 %v2071_v7, %s4182_s15  ;;  %1947 = vrot.lane.b32.xlu0 %v1924_v9, %s4175_s8  ;;  %s4184_s8 = smov 120  }
 0x2bd   : > { %1994 = vrot.lane.b32.xlu1 %v5039_v37, %s4177_s13  ;;  %2140 = vrot.lane.b32.xlu0 %v5039_v37, %s4180_s22  ;;  %s269_s13 = sand.u32 1, %s4161_s25  }
 0x2c1   : > { %2043 = vrot.lane.b32.xlu1 %v1875_v4, %s4179_s19  ;;  %2189 = vrot.lane.b32.xlu0 %v1875_v4, %s4181_s29  ;;  %v5329_v4 = vpack.c.bf16 %v2499_v18, %v2492_v15  ;;  %s3274_s19 = sshll.u32 %s269_s13, 6  ;;  %s3317_s29 = sshll.u32 %s4248_s28, 10 }
 0x2c2   : > { %s271_s22 = scalar_lea.vmem [#allocation6], %s3274_s19  ;;  %s5546_s16 = scalar_lea.hbm %s5603_s7, %s3317_s29 }
 0x2c3   : > { %s5554_s28 = scalar_lea.sflag [#allocation7], %s269_s13 }
 0x2c5   : > { %2092 = vrot.lane.b32.xlu1 %v1924_v9, %s4182_s15  ;;  %2238 = vrot.lane.b32.xlu0 %v1924_v9, %s4183_s17  ;;  %s3208_s15 = sshll.u32 %s271_s22, 4  ;;  %s5548_s15 = int_to_ptr.vmem [resolvable:$true] %s3208_s15 }
 0x2c6   : > { %s4107_s18 = scalar_lea.vmem %s5548_s15, 1024  ;;  %p4114_p0 = scmp.lt.s32.totalorder %s5548_s15, %s4112_s14 }
 0x2c7   : > { %v2131_v28 = vpop.permute.xlu0 %2130  ;;  %v1985_v29 = vpop.permute.xlu1 %1984  ;;  %p4108_p11 = scmp.ne.s32.totalorder %s5548_s15, %s4107_s18  ;;  %p4115_p1 = scmp.lt.s32.totalorder %s4113_s20, %s4107_s18 }
 0x2c9   : > { %2242 = vrot.lane.b32.xlu1 %v2219_v27, %s4183_s17  ;;  %2240 = vrot.lane.b32.xlu0 %v2071_v7, %s4183_s17  ;;  %v2520_v27 = vand.u32 4294901760, %v5267_v41  ;;  %p4109_p12 = pnand %p4108_p11, %p4265_p5  ;;  %p4116_p2 = por %p4115_p1, %p4114_p0 }
 0x2cb   : > { %v2034_v30 = vpop.permute.xlu1 %2033  ;;  %v1983_v2 = vpop.permute.xlu0 %1982  ;;  %p4110_p13 = pneg %p4109_p12 }
 0x2cc   : > { %2007 = vst.msk [vmem:[#allocation5] sm:$0xff] %vm2006_vm0, %v1983_v2 }
 0x2cd   : > { %2288 = vrot.lane.b32.xlu1 %v4978_v58, %s4184_s8  ;;  %2286 = vrot.lane.b32.xlu0 %v4984_v8, %s4184_s8  ;;  %v5248_v58 = vsub.f32 %v5071_v51, %v2342_v57  ;;  %v5253_v8 = vsub.f32 %v5076_v55, %v2345_v60  ;;  %p4117_p3 = pnand %p4116_p2, %p4110_p13 }
 0x2cf   : > { %v2083_v32 = vpop.permute.xlu1 %2082  ;;  %v2032_v33 = vpop.permute.xlu0 %2031  ;;  %v2506_v62 = vand.u32 4294901760, %v5248_v58  ;;  %v2513_v3 = vand.u32 4294901760, %v5253_v8 }
 0x2d0   : > { %2056 = vst.msk [vmem:[#allocation5] sm:$0xff] %vm2055_vm1, %v2032_v33 }
 0x2d1   : > { %2292 = vrot.lane.b32.xlu1 %v4987_v17, %s4184_s8  ;;  %2290 = vrot.lane.b32.xlu0 %v4990_v40, %s4184_s8  ;;  %v5262_v17 = vpack.c.bf16 %v5253_v8, %v5248_v58  ;;  %v2507_v22 = vsub.f32 %v5248_v58, %v2506_v62  ;;  %v2514_v24 = vsub.f32 %v5253_v8, %v2513_v3  ;;  %v2541_v58 = vand.u32 4294901760, %v5289_v46 }
 0x2d2   : > { %v5338_v11 = vpack.c.bf16 %v2513_v3, %v2506_v62 }
 0x2d3   : > { %v1889_v36 = vpop.permute.xlu1 %1888  ;;  %v2081_v37 = vpop.permute.xlu0 %2080  ;;  %v2515_v2 = vand.u32 4294901760, %v2514_v24 }
 0x2d4   : > { %1911 = vst.msk [vmem:[#allocation5 + $0x10] sm:$0xff] %vm1908_vm14, %v1889_v36 }
 0x2d5   : > { %2105 = vst.msk [vmem:[#allocation5] sm:$0xff] %vm2104_vm2, %v2081_v37  ;;  %2296 = vrot.lane.b32.xlu1 %v4995_v63, %s4184_s8  ;;  %2294 = vrot.lane.b32.xlu0 %v4998_v5, %s4184_s8  ;;  %v5272_v63 = vsub.f32 %v5101_v44, %v2351_v31  ;;  %v2534_v37 = vand.u32 4294901760, %v5284_v45 }
 0x2d6   : > { %2155 = vst.msk [vmem:[#allocation5] sm:$0xff] %vm2154_vm3, %v2131_v28 }
 0x2d7   : > { %v2180_v40 = vpop.permute.xlu1 %2179  ;;  %v2038_v21 = vpop.permute.xlu0 %2037  ;;  %v5279_v5 = vpack.c.bf16 %v5272_v63, %v5267_v41  ;;  %v2527_v28 = vand.u32 4294901760, %v5272_v63 }
 0x2d8   : > { %2204 = vst.msk [vmem:[#allocation5] sm:$0xff] %vm2203_vm4, %v2180_v40 }
 0x2d9   : > { %2300 = vrot.lane.b32.xlu1 %v5003_v1, %s4184_s8  ;;  %2298 = vrot.lane.b32.xlu0 %v5006_v48, %s4184_s8  ;;  %v5294_v1 = vpack.c.bf16 %v5289_v46, %v5284_v45  ;;  %v2528_v33 = vsub.f32 %v5272_v63, %v2527_v28  ;;  %v5350_v8 = vpack.c.bf16 %v2527_v28, %v2520_v27 }
 0x2da   : > { %v2535_v63 = vsub.f32 %v5284_v45, %v2534_v37 }
 0x2db   : > { %v1938_v42 = vpop.permute.xlu1 %1937  ;;  %v2087_v43 = vpop.permute.xlu0 %2086 }
 0x2dc   : > { %1960 = vst.msk [vmem:[#allocation5 + $0x10] sm:$0xff] %vm1957_vm15, %v1938_v42 }
 0x2df   : > { %v2229_v48 = vpop.permute.xlu1 %2228  ;;  %v2133_v51 = vpop.permute.xlu0 %2132 }
 0x2e0   : > { %2253 = vst.msk [vmem:[#allocation5] sm:$0xff] %vm2252_vm5, %v2229_v48 }
 0x2e3   : > { %v1887_v55 = vpop.permute.xlu1 %1886  ;;  %v1891_v57 = vpop.permute.xlu0 %1890 }
 0x2e4   : > { %1910 = vst.msk [vmem:[#allocation5 + $0x8] sm:$0xff] %vm1908_vm14, %v1887_v55  ;;  %1912 = vst.msk [vmem:[#allocation5 + $0x18] sm:$0xff] %vm1908_vm14, %v1891_v57  ;;  %v2542_v55 = vsub.f32 %v5289_v46, %v2541_v58  ;;  %v5359_v57 = vsub.f32 %v5147_v13, %v5151_v35  ;;  %v2536_v46 = vand.u32 4294901760, %v2535_v63 }
 0x2e6   : > { %v5368_v13 = vand.u32 4294901760, %v5359_v57 }
 0x2e7   : > { %v1936_v60 = vpop.permute.xlu1 %1935  ;;  %v2182_v39 = vpop.permute.xlu0 %2181  ;;  %v2261_v44 = vld [vmem:[#allocation5] sm:$0xff] }
 0x2e8   : > { %1959 = vst.msk [vmem:[#allocation5 + $0x8] sm:$0xff] %vm1957_vm15, %v1936_v60  ;;  %v2312_v49 = vsel %vm2310_vm6, %v2261_v44, 0  ;;  %v5361_v60 = vpack.c.bf16 %v2541_v58, %v2534_v37 }
 0x2e9   : > { %2008 = vst.msk [vmem:[#allocation5 + $0x8] sm:$0xff] %vm2006_vm0, %v1985_v29  ;;  %v5302_v31 = vand.u32 4294901760, %v2312_v49 }
 0x2ea   : > { %2057 = vst.msk [vmem:[#allocation5 + $0x8] sm:$0xff] %vm2055_vm1, %v2034_v30  ;;  %v2508_v30 = vand.u32 4294901760, %v2507_v22 }
 0x2eb   : > { %2106 = vst.msk [vmem:[#allocation5 + $0x8] sm:$0xff] %vm2104_vm2, %v2083_v32  ;;  %3798 = vmatprep.mubr.f32.mxu0 %v5302_v31  ;;  %v1989_v16 = vpop.permute.xlu1 %1988  ;;  %v1940_v0 = vpop.permute.xlu0 %1939  ;;  %v5308_v56 = vsub.f32 %v2312_v49, %v5302_v31  ;;  %v2521_v32 = vsub.f32 %v5267_v41, %v2520_v27  ;;  %v2543_v49 = vand.u32 4294901760, %v2542_v55 }
 0x2ec   : > { %2156 = vst.msk [vmem:[#allocation5 + $0x8] sm:$0xff] %vm2154_vm3, %v2133_v51  ;;  %v2529_v51 = vand.u32 4294901760, %v2528_v33 }
 0x2ed   : > { %1961 = vst.msk [vmem:[#allocation5 + $0x18] sm:$0xff] %vm1957_vm15, %v1940_v0  ;;  %v2411_v59 = vand.u32 4294901760, %v5308_v56  ;;  %v2522_v48 = vand.u32 4294901760, %v2521_v32 }
 0x2ee   : > { %2205 = vst.msk [vmem:[#allocation5 + $0x8] sm:$0xff] %vm2203_vm4, %v2182_v39 }
 0x2ef   : > { %2010 = vst.msk [vmem:[#allocation5 + $0x18] sm:$0xff] %vm2006_vm0, %v1989_v16  ;;  %v1893_v6 = vpop.permute.xlu1 %1892  ;;  %v2231_v14 = vpop.permute.xlu0 %2230  ;;  %v2412_v38 = vsub.f32 %v5308_v56, %v2411_v59  ;;  %v3882_v45 = vpack.c.bf16 %v2529_v51, %v2522_v48 }
 0x2f0   : > { %2059 = vst.msk [vmem:[#allocation5 + $0x18] sm:$0xff] %vm2055_vm1, %v2038_v21 }
 0x2f1   : > { %2108 = vst.msk [vmem:[#allocation5 + $0x18] sm:$0xff] %vm2104_vm2, %v2087_v43  ;;  %v2413_v47 = vand.u32 4294901760, %v2412_v38  ;;  %v3878_v43 = vpack.c.bf16 %v2515_v2, %v2508_v30 }
 0x2f2   : > { %1913 = vst.msk [vmem:[#allocation5 + $0x20] sm:$0xff] %vm1908_vm14, %v1893_v6  ;;  %v2549_v6 = vsub.f32 %v5359_v57, %v5368_v13 }
 0x2f3   : > { %2254 = vst.msk [vmem:[#allocation5 + $0x8] sm:$0xff] %vm2252_vm5, %v2231_v14  ;;  %3648 = vmatprep.mubr.f32.mxu1 %v2413_v47  ;;  %v1942_v52 = vpop.permute.xlu1 %1941  ;;  %v2036_v54 = vpop.permute.xlu0 %2035 }
 0x2f4   : > { %1962 = vst.msk [vmem:[#allocation5 + $0x20] sm:$0xff] %vm1957_vm15, %v1942_v52  ;;  %v2550_v47 = vand.u32 4294901760, %v2549_v6 }
 0x2f7   : > { %v2135_v7 = vpop.permute.xlu1 %2134  ;;  %v1993_v9 = vpop.permute.xlu0 %1992 }
 0x2fa   : > { %v2262_v20 = vld [vmem:[#allocation5 + $0x8] sm:$0xff] }
 0x2fb   : > { %v2315_v23 = vsel %vm2310_vm6, %v2262_v20, 0  ;;  %v2184_v12 = vpop.permute.xlu1 %2183  ;;  %v1897_v15 = vpop.permute.xlu0 %1896 }
 0x2fc   : > { %v5336_v29 = vand.u32 4294901760, %v2315_v23  ;;  %1915 = vst.msk [vmem:[#allocation5 + $0x30] sm:$0xff] %vm1908_vm14, %v1897_v15 }
 0x2fe   : > { %3799 = vmatmul.mubr.f32.vlgmr.msra.gmra.mrb[8].mxu0 %v5336_v29  ;;  %v5342_v18 = vsub.f32 %v2315_v23, %v5336_v29 }
 0x2ff   : > { %v2233_v40 = vpop.permute.xlu1 %2232  ;;  %v2091_v21 = vpop.permute.xlu0 %2090 }
 0x300   : > { %v2421_v36 = vand.u32 4294901760, %v5342_v18 }
 0x302   : > { %v2422_v42 = vsub.f32 %v5342_v18, %v2421_v36 }
 0x303   : > { %v1987_v39 = vpop.permute.xlu1 %1986  ;;  %v1895_v44 = vpop.permute.xlu0 %1894 }
 0x304   : > { %v2423_v41 = vand.u32 4294901760, %v2422_v42  ;;  %2009 = vst.msk [vmem:[#allocation5 + $0x10] sm:$0xff] %vm2006_vm0, %v1987_v39 }
 0x305   : > { %1914 = vst.msk [vmem:[#allocation5 + $0x28] sm:$0xff] %vm1908_vm14, %v1895_v44 }
 0x306   : > { %3649 = vmatmul.mubr.f32.vlgmr.msra.gmra.mrb[0].mxu1 %v2423_v41  ;;  %2058 = vst.msk [vmem:[#allocation5 + $0x10] sm:$0xff] %vm2055_vm1, %v2036_v54 }
 0x307   : > { %3877 = vmatpush3.bf16.msra.mxu1 %v5224_v25  ;;  %v2085_v16 = vpop.permute.xlu1 %2084  ;;  %v1944_v0 = vpop.permute.xlu0 %1943  ;;  %v3886_v25 = vpack.c.bf16 %v2543_v49, %v2536_v46 }
 0x308   : > { %3879 = vmatprep.subr.bf16.mxu1 %v3878_v43  ;;  %2107 = vst.msk [vmem:[#allocation5 + $0x10] sm:$0xff] %vm2104_vm2, %v2085_v16 }
 0x309   : > { %1963 = vst.msk [vmem:[#allocation5 + $0x28] sm:$0xff] %vm1957_vm15, %v1944_v0 }
 0x30a   : > { %2157 = vst.msk [vmem:[#allocation5 + $0x10] sm:$0xff] %vm2154_vm3, %v2135_v7 }
 0x30b   : > { %3881 = vmatpush3.bf16.msra.mxu1 %v3878_v43  ;;  %2012 = vst.msk [vmem:[#allocation5 + $0x28] sm:$0xff] %vm2006_vm0, %v1993_v9  ;;  %v2042_v14 = vpop.permute.xlu1 %2041  ;;  %v2137_v38 = vpop.permute.xlu0 %2136 }
 0x30c   : > { %3883 = vmatprep.subr.bf16.mxu1 %v3882_v45  ;;  %2206 = vst.msk [vmem:[#allocation5 + $0x10] sm:$0xff] %vm2203_vm4, %v2184_v12 }
 0x30d   : > { %2255 = vst.msk [vmem:[#allocation5 + $0x10] sm:$0xff] %vm2252_vm5, %v2233_v40 }
 0x30e   : > { %2061 = vst.msk [vmem:[#allocation5 + $0x28] sm:$0xff] %vm2055_vm1, %v2042_v14 }
 0x30f   : > { %2158 = vst.msk [vmem:[#allocation5 + $0x18] sm:$0xff] %vm2154_vm3, %v2137_v38  ;;  %3885 = vmatpush3.bf16.msra.mxu1 %v3882_v45  ;;  %v1946_v52 = vpop.permute.xlu1 %1945  ;;  %v2186_v54 = vpop.permute.xlu0 %2185 }
 0x310   : > { %2110 = vst.msk [vmem:[#allocation5 + $0x28] sm:$0xff] %vm2104_vm2, %v2091_v21  ;;  %3887 = vmatprep.subr.bf16.mxu1 %v3886_v25 }
 0x311   : > { %1964 = vst.msk [vmem:[#allocation5 + $0x30] sm:$0xff] %vm1957_vm15, %v1946_v52 }
 0x312   : > { %2207 = vst.msk [vmem:[#allocation5 + $0x18] sm:$0xff] %vm2203_vm4, %v2186_v54 }
 0x313   : > { %3889 = vmatpush3.bf16.msra.mxu1 %v3886_v25  ;;  %v2139_v3 = vpop.permute.xlu1 %2138  ;;  %v2089_v7 = vpop.permute.xlu0 %2088 }
 0x314   : > { %3676 = vmatprep.subr.mxu1 %v2550_v47  ;;  %v2263_v62 = vld [vmem:[#allocation5 + $0x10] sm:$0xff] }
 0x315   : > { %v2318_v9 = vsel %vm2310_vm6, %v2263_v62, 0 }
 0x316   : > { %v5384_v20 = vand.u32 4294901760, %v2318_v9 }
 0x317   : > { %3677 = vmatpush3.msra.mxu1 %v2550_v47  ;;  %v2188_v23 = vpop.permute.xlu1 %2187  ;;  %v1997_v24 = vpop.permute.xlu0 %1996 }
 0x318   : > { %3891 = vmatprep.subr.bf16.mxu1 %v5243_v34  ;;  %3801 = vmatprep.mubr.f32.mxu0 %v5384_v20  ;;  %v5389_v22 = vsub.f32 %v2318_v9, %v5384_v20 }
 0x31a   : > { %v2431_v27 = vand.u32 4294901760, %v5389_v22 }
 0x31b   : > { %v2237_v12 = vpop.permute.xlu1 %2236  ;;  %v2046_v15 = vpop.permute.xlu0 %2045 }
 0x31c   : > { %v2432_v28 = vsub.f32 %v5389_v22, %v2431_v27 }
 0x31e   : > { %v2433_v30 = vand.u32 4294901760, %v2432_v28 }
 0x31f   : > { %v1991_v2 = vpop.permute.xlu1 %1990  ;;  %v2143_v32 = vpop.permute.xlu0 %2142 }
 0x320   : > { %3651 = vmatprep.mubr.f32.mxu1 %v2433_v30  ;;  %2011 = vst.msk [vmem:[#allocation5 + $0x20] sm:$0xff] %vm2006_vm0, %v1991_v2 }
 0x323   : > { %v2040_v33 = vpop.permute.xlu1 %2039  ;;  %v2192_v37 = vpop.permute.xlu0 %2191 }
 0x324   : > { %2060 = vst.msk [vmem:[#allocation5 + $0x20] sm:$0xff] %vm2055_vm1, %v2040_v33 }
 0x325   : > { %2109 = vst.msk [vmem:[#allocation5 + $0x20] sm:$0xff] %vm2104_vm2, %v2089_v7 }
 0x326   : > { %2159 = vst.msk [vmem:[#allocation5 + $0x20] sm:$0xff] %vm2154_vm3, %v2139_v3 }
 0x327   : > { %2208 = vst.msk [vmem:[#allocation5 + $0x20] sm:$0xff] %vm2203_vm4, %v2188_v23  ;;  %v2235_v58 = vpop.permute.xlu1 %2234  ;;  %v1899_v40 = vpop.permute.xlu0 %1898 }
 0x328   : > { %2257 = vst.msk [vmem:[#allocation5 + $0x20] sm:$0xff] %vm2252_vm5, %v2237_v12  ;;  %2256 = vst.msk [vmem:[#allocation5 + $0x18] sm:$0xff] %vm2252_vm5, %v2235_v58 }
 0x329   : > { %1916 = vst.msk [vmem:[#allocation5 + $0x38] sm:$0xff] %vm1908_vm14, %v1899_v40 }
 0x32b   : > { %v2095_v21 = vpop.permute.xlu1 %2094  ;;  %v1948_v42 = vpop.permute.xlu0 %1947 }
 0x32c   : > { %1965 = vst.msk [vmem:[#allocation5 + $0x38] sm:$0xff] %vm1957_vm15, %v1948_v42 }
 0x32d   : > { %2014 = vst.msk [vmem:[#allocation5 + $0x38] sm:$0xff] %vm2006_vm0, %v1997_v24 }
 0x32e   : > { %2063 = vst.msk [vmem:[#allocation5 + $0x38] sm:$0xff] %vm2055_vm1, %v2046_v15 }
 0x32f   : > { %2112 = vst.msk [vmem:[#allocation5 + $0x38] sm:$0xff] %vm2104_vm2, %v2095_v21  ;;  %v1995_v43 = vpop.permute.xlu1 %1994  ;;  %v2141_v48 = vpop.permute.xlu0 %2140  ;;  %v2264_v51 = vld [vmem:[#allocation5 + $0x18] sm:$0xff]  ;;  %v2265_v41 = vld [vmem:[#allocation5 + $0x20] sm:$0xff] }
 0x330   : > { %2013 = vst.msk [vmem:[#allocation5 + $0x30] sm:$0xff] %vm2006_vm0, %v1995_v43  ;;  %v2321_v63 = vsel %vm2310_vm6, %v2264_v51, 0  ;;  %v2324_v55 = vsel %vm2310_vm6, %v2265_v41, 0 }
 0x331   : > { %2162 = vst.msk [vmem:[#allocation5 + $0x38] sm:$0xff] %vm2154_vm3, %v5212_v19  ;;  %2160 = vst.msk [vmem:[#allocation5 + $0x28] sm:$0xff] %vm2154_vm3, %v2141_v48  ;;  %v5415_v39 = vand.u32 4294901760, %v2321_v63  ;;  %v5417_v44 = vand.u32 4294901760, %v2324_v55 }
 0x332   : > { %2211 = vst.msk [vmem:[#allocation5 + $0x38] sm:$0xff] %vm2203_vm4, %v5228_v26 }
 0x333   : > { %3802 = vmatmul.mubr.f32.gmra.mrb[10].mxu0 %v5415_v39  ;;  %v2044_v45 = vpop.permute.xlu1 %2043  ;;  %v2190_v46 = vpop.permute.xlu0 %2189  ;;  %v5421_v49 = vsub.f32 %v2321_v63, %v5415_v39  ;;  %v5424_v19 = vsub.f32 %v2324_v55, %v5417_v44 }
 0x334   : > { %2062 = vst.msk [vmem:[#allocation5 + $0x30] sm:$0xff] %vm2055_vm1, %v2044_v45 }
 0x335   : > { %2209 = vst.msk [vmem:[#allocation5 + $0x28] sm:$0xff] %vm2203_vm4, %v2190_v46  ;;  %v2441_v26 = vand.u32 4294901760, %v5421_v49  ;;  %v2451_v16 = vand.u32 4294901760, %v5424_v19 }
 0x337   : > { %v2093_v0 = vpop.permute.xlu1 %2092  ;;  %v2239_v25 = vpop.permute.xlu0 %2238  ;;  %v2442_v6 = vsub.f32 %v5421_v49, %v2441_v26  ;;  %v2452_v14 = vsub.f32 %v5424_v19, %v2451_v16 }
 0x338   : > { %2111 = vst.msk [vmem:[#allocation5 + $0x30] sm:$0xff] %vm2104_vm2, %v2093_v0 }
 0x339   : > { %2258 = vst.msk [vmem:[#allocation5 + $0x28] sm:$0xff] %vm2252_vm5, %v2239_v25  ;;  %v2443_v38 = vand.u32 4294901760, %v2442_v6  ;;  %v2453_v47 = vand.u32 4294901760, %v2452_v14 }
 0x33a   : > { %2161 = vst.msk [vmem:[#allocation5 + $0x30] sm:$0xff] %vm2154_vm3, %v2143_v32 }
 0x33b   : > { %2210 = vst.msk [vmem:[#allocation5 + $0x30] sm:$0xff] %vm2203_vm4, %v2192_v37  ;;  %3652 = vmatmul.mubr.f32.gmra.mrb[2].mxu1 %v2443_v38  ;;  %v2243_v52 = vpop.permute.xlu1 %2242  ;;  %v2241_v54 = vpop.permute.xlu0 %2240 }
 0x33c   : > { %2260 = vst.msk [vmem:[#allocation5 + $0x38] sm:$0xff] %vm2252_vm5, %v2243_v52  ;;  %2259 = vst.msk [vmem:[#allocation5 + $0x30] sm:$0xff] %vm2252_vm5, %v2241_v54  ;;  %3654 = vmatprep.mubr.f32.mxu1 %v2453_v47 }
 0x340   : > { %v2266_v62 = vld [vmem:[#allocation5 + $0x28] sm:$0xff] }
 0x341   : > { %v2327_v3 = vsel %vm2310_vm6, %v2266_v62, 0 }
 0x342   : > { %v5443_v7 = vand.u32 4294901760, %v2327_v3 }
 0x343   : > { %v2267_v23 = vld [vmem:[#allocation5 + $0x30] sm:$0xff]  ;;  %v2268_v24 = vld [vmem:[#allocation5 + $0x38] sm:$0xff] }
 0x344   : > { %v5446_v9 = vsub.f32 %v2327_v3, %v5443_v7  ;;  %v2330_v28 = vsel %vm2310_vm6, %v2267_v23, 0  ;;  %v2333_v12 = vsel %vm2310_vm6, %v2268_v24, 0 }
 0x345   : > { %v5451_v30 = vand.u32 4294901760, %v2330_v28  ;;  %v5453_v2 = vand.u32 4294901760, %v2333_v12 }
 0x346   : > { %v2461_v15 = vand.u32 4294901760, %v5446_v9 }
 0x347   : > { %v2470_v33 = vsub.f32 %v2330_v28, %v5451_v30  ;;  %v2480_v37 = vsub.f32 %v2333_v12, %v5453_v2 }
 0x348   : > { %v2462_v32 = vsub.f32 %v5446_v9, %v2461_v15 }
 0x349   : > { %v2471_v40 = vand.u32 4294901760, %v2470_v33  ;;  %v2481_v21 = vand.u32 4294901760, %v2480_v37 }
 0x34a   : > { %v2463_v58 = vand.u32 4294901760, %v2462_v32 }
 0x34b   : > { %v2472_v42 = vsub.f32 %v2470_v33, %v2471_v40  ;;  %v2482_v43 = vsub.f32 %v2480_v37, %v2481_v21 }
 0x34c   : > { %3655 = vmatmul.mubr.f32.gmra.mrb[4].mxu1 %v2463_v58 }
 0x34d   : > { %v2473_v48 = vand.u32 4294901760, %v2472_v42  ;;  %v2483_v51 = vand.u32 4294901760, %v2482_v43 }
 0x34f   : > { %3657 = vmatprep.mubr.f32.mxu1 %v2473_v48 }
 0x350   : > { %3658 = vmatmul.mubr.f32.gmra.mrb[6].mxu1 %v2483_v51 }
 0x351   : > { %3678 = vmatprep.mubr.f32.mxu1 %v5302_v31 }
 0x354   : > { %3679 = vmatmul.mubr.f32.vlgmr.msra.gmra.mrb[0].mxu1 %v5336_v29 }
 0x355   : > { %3893 = vmatpush3.bf16.msra.mxu1 %v5243_v34  ;;  %3681 = vmatprep.mubr.f32.mxu1 %v5384_v20 }
 0x356   : > { %3895 = vmatprep.subr.bf16.mxu1 %v5262_v17 }
 0x358   : > { %3682 = vmatmul.mubr.f32.gmra.mrb[2].mxu1 %v5415_v39 }
 0x359   : > { %3897 = vmatpush3.bf16.msra.mxu1 %v5262_v17  ;;  %3684 = vmatprep.mubr.f32.mxu1 %v5417_v44  ;;  %v2289_v17 = vpop.permute.xlu1 %2288 }
 0x35a   : > { %3899 = vmatprep.subr.bf16.mxu1 %v5279_v5 }
 0x35c   : > { %3685 = vmatmul.mubr.f32.gmra.mrb[4].mxu1 %v5443_v7 }
 0x35d   : > { %3901 = vmatpush3.bf16.msra.mxu1 %v5279_v5  ;;  %3687 = vmatprep.mubr.f32.mxu1 %v5451_v30  ;;  %v2287_v5 = vpop.permute.xlu0 %2286 }
 0x35e   : > { %3903 = vmatprep.subr.bf16.mxu1 %v5294_v1 }
 0x360   : > { %3688 = vmatmul.mubr.f32.gmra.mrb[6].mxu1 %v5453_v2 }
 0x361   : > { %3905 = vmatpush3.bf16.msra.mxu1 %v5294_v1  ;;  %3708 = vmatprep.mubr.f32.mxu1 %v5308_v56 }
 0x362   : > { %3706 = vmatprep.subr.mxu1 %v5359_v57 }
 0x365   : > { %3707 = vmatpush3.msra.mxu1 %v5359_v57 }
 0x366   : > { %3709 = vmatmul.mubr.f32.vlgmr.msra.gmra.mrb[0].mxu1 %v5342_v18  ;;  %3907 = vmatprep.subr.bf16.mxu1 %v5064_v50 }
 0x367   : > { %3711 = vmatprep.mubr.f32.mxu1 %v5389_v22  ;;  %3909 = vmatpush3.bf16.msra.mxu1 %v5064_v50 }
 0x368   : > { %3911 = vmatprep.subr.bf16.mxu1 %v5088_v61 }
 0x36a   : > { %3712 = vmatmul.mubr.f32.gmra.mrb[2].mxu1 %v5421_v49 }
 0x36b   : > { %3714 = vmatprep.mubr.f32.mxu1 %v5424_v19  ;;  %3913 = vmatpush3.bf16.msra.mxu1 %v5088_v61 }
 0x36c   : > { %3915 = vmatprep.subr.bf16.mxu1 %v5113_v53 }
 0x36e   : > { %3715 = vmatmul.mubr.f32.gmra.mrb[4].mxu1 %v5446_v9 }
 0x36f   : > { %3717 = vmatprep.mubr.f32.mxu1 %v2470_v33  ;;  %3917 = vmatpush3.bf16.msra.mxu1 %v5113_v53 }
 0x370   : > { %3919 = vmatprep.subr.bf16.mxu1 %v5137_v10 }
 0x372   : > { %3718 = vmatmul.mubr.f32.gmra.mrb[6].mxu1 %v2480_v37 }
 0x373   : > { %3921 = vmatpush3.bf16.msra.mxu1 %v5137_v10  ;;  %3738 = vmatprep.mubr.f32.mxu1 %v2411_v59  ;;  %v2293_v59 = vpop.permute.xlu1 %2292 }
 0x374   : > { %3736 = vmatprep.subr.mxu1 %v5151_v35 }
 0x377   : > { %3737 = vmatpush3.msra.mxu1 %v5151_v35 }
 0x378   : > { %3739 = vmatmul.mubr.f32.vlgmr.msra.gmra.mrb[0].mxu1 %v2421_v36  ;;  %3923 = vmatprep.subr.bf16.mxu1 %v5329_v4 }
 0x379   : > { %3741 = vmatprep.mubr.f32.mxu1 %v2431_v27  ;;  %3925 = vmatpush3.bf16.msra.mxu1 %v5329_v4 }
 0x37a   : > { %3927 = vmatprep.subr.bf16.mxu1 %v5338_v11 }
 0x37c   : > { %3742 = vmatmul.mubr.f32.gmra.mrb[2].mxu1 %v2441_v26 }
 0x37d   : > { %3744 = vmatprep.mubr.f32.mxu1 %v2451_v16  ;;  %3929 = vmatpush3.bf16.msra.mxu1 %v5338_v11  ;;  %v2291_v11 = vpop.permute.xlu0 %2290 }
 0x37e   : > { %3931 = vmatprep.subr.bf16.mxu1 %v5350_v8 }
 0x380   : > { %3745 = vmatmul.mubr.f32.gmra.mrb[4].mxu1 %v2461_v15 }
 0x381   : > { %3747 = vmatprep.mubr.f32.mxu1 %v2471_v40  ;;  %3933 = vmatpush3.bf16.msra.mxu1 %v5350_v8 }
 0x382   : > { %3935 = vmatprep.subr.bf16.mxu1 %v5361_v60 }
 0x384   : > { %3748 = vmatmul.mubr.f32.gmra.mrb[6].mxu1 %v2481_v21 }
 0x385   : > { %3937 = vmatpush3.bf16.msra.mxu1 %v5361_v60  ;;  %3768 = vmatprep.mubr.f32.mxu1 %v5302_v31 }
 0x386   : > { %3766 = vmatprep.subr.mxu1 %v5368_v13 }
 0x389   : > { %3767 = vmatpush3.msra.mxu1 %v5368_v13  ;;  %v2297_v13 = vpop.permute.xlu1 %2296 }
 0x38a   : > { %3769 = vmatmul.mubr.f32.vlgmr.msra.gmra.mrb[0].mxu1 %v5336_v29  ;;  %3954 = vmatprep.subr.bf16.mxu1 %v5064_v50 }
 0x38b   : > { %3771 = vmatprep.mubr.f32.mxu1 %v5384_v20  ;;  %3959 = vmatpush3.bf16.msra.mxu1 %v5064_v50  ;;  %v2295_v20 = vpop.permute.xlu0 %2294 }
 0x38c   : > { %3955 = vmatprep.subr.bf16.mxu1 %v5088_v61 }
 0x38d   : > { %v2301_v55 = vpop.permute.xlu1 %2300 }
 0x38e   : > { %3772 = vmatmul.mubr.f32.gmra.mrb[2].mxu1 %v5415_v39 }
 0x38f   : > { %3774 = vmatprep.mubr.f32.mxu1 %v5417_v44  ;;  %3960 = vmatpush3.bf16.msra.mxu1 %v5088_v61 }
 0x390   : > { %3956 = vmatprep.subr.bf16.mxu1 %v5113_v53 }
 0x392   : > { %3775 = vmatmul.mubr.f32.gmra.mrb[4].mxu1 %v5443_v7 }
 0x393   : > { %3777 = vmatprep.mubr.f32.mxu1 %v5451_v30  ;;  %3961 = vmatpush3.bf16.msra.mxu1 %v5113_v53 }
 0x394   : > { %3957 = vmatprep.subr.bf16.mxu1 %v5137_v10 }
 0x396   : > { %3778 = vmatmul.mubr.f32.gmra.mrb[6].mxu1 %v5453_v2 }
 0x397   : > { %3962 = vmatpush3.bf16.msra.mxu1 %v5137_v10  ;;  %3804 = vmatprep.mubr.f32.mxu1 %v5417_v44  ;;  %v2299_v44 = vpop.permute.xlu0 %2298 }
 0x398   : > { %3958 = vmatprep.subr.mxu1 %v5151_v35 }
 0x39b   : > { %3963 = vmatpush3.msra.mxu1 %v5151_v35 }
 0x39c   : > { %3805 = vmatmul.mubr.f32.vlgmr.msra.gmra.mrb[4].mxu1 %v5443_v7 }
 0x39d   : > { %3807 = vmatprep.mubr.f32.mxu1 %v5451_v30 }
 0x3a0   : > { %3808 = vmatmul.mubr.f32.gmra.mrb[6].mxu1 %v5453_v2 }
 0x3d1   : > { %v3800_v50 = vpop.f32.mrb[8].mxu0 }
 0x3d2   : > { %v3140_v61 = vpop.f32.mrb[9].mxu0 }
 0x406   : > { %v3803_v53 = vpop.f32.mrb[10].mxu0 }
 0x407   : > { %v3152_v34 = vpop.f32.mrb[11].mxu0 }
 0x45d   : > { %v3770_v10 = vpop.f32.mrb[0].mxu1 }
 0x45e   : > { %v3964_v1 = vadd.f32 %v3770_v10, %v2289_v17  ;;  %v3018_v31 = vpop.f32.mrb[1].mxu1 }
 0x45f   : > { %v3966_v56 = vadd.f32 %v3018_v31, %v2287_v5 }
 0x460   : > { %v3965_v35 = vadd.f32 %v3964_v1, %v3800_v50 }
 0x461   : > { %v3967_v4 = vadd.f32 %v3966_v56, %v3140_v61  ;;  %v3773_v29 = vpop.f32.mrb[2].mxu1 }
 0x462   : > { %3187 = vst.msk [vmem:[%s271_s22 + $0x8] sm:$0xff] %vm1821_vm12, %v3965_v35  ;;  %v3968_v18 = vadd.f32 %v3773_v29, %v2293_v59  ;;  %v3030_v36 = vpop.f32.mrb[3].mxu1 }
 0x463   : > { %3186 = vst.msk [vmem:[%s271_s22] sm:$0xff] %vm1821_vm12, %v3967_v4  ;;  %v3970_v8 = vadd.f32 %v3030_v36, %v2291_v11 }
 0x464   : > { %v3969_v57 = vadd.f32 %v3968_v18, %v3803_v53 }
 0x465   : > { %v3971_v60 = vadd.f32 %v3970_v8, %v3152_v34 }
 0x466   : > { %3189 = vst.msk [vmem:[%s271_s22 + $0x18] sm:$0xff] %vm1821_vm12, %v3969_v57 }
 0x467   : > { %3188 = vst.msk [vmem:[%s271_s22 + $0x10] sm:$0xff] %vm1821_vm12, %v3971_v60 }
 0x46f   : > { %v3806_v22 = vpop.f32.mrb[4].mxu1 }
 0x470   : > { %v3972_v27 = vadd.f32 %v3806_v22, %v2297_v13  ;;  %v3164_v41 = vpop.f32.mrb[5].mxu1 }
 0x471   : > { %v3973_v63 = vadd.f32 %v3164_v41, %v2295_v20 }
 0x472   : > { %3191 = vst.msk [vmem:[%s271_s22 + $0x28] sm:$0xff] %vm1821_vm12, %v3972_v27 }
 0x473   : > { %3190 = vst.msk [vmem:[%s271_s22 + $0x20] sm:$0xff] %vm1821_vm12, %v3973_v63  ;;  %v3809_v39 = vpop.f32.mrb[6].mxu1 }
 0x474   : > { %v3974_v45 = vadd.f32 %v3809_v39, %v2301_v55  ;;  %v3176_v46 = vpop.f32.mrb[7].mxu1 }
 0x475   : > { %v3975_v49 = vadd.f32 %v3176_v46, %v2299_v44 }
 0x476   : > { %3193 = vst.msk [vmem:[%s271_s22 + $0x38] sm:$0xff] %vm1821_vm12, %v3974_v45 }
 0x477   : > { %3192 = vst.msk [vmem:[%s271_s22 + $0x30] sm:$0xff] %vm1821_vm12, %v3975_v49 }
 0x478   : > { %4120 = shalt.err (!%p4117_p3)
}
 0x479   : > { %s4121_s8 = scalar_lea.hbm %s5546_s16, 1024  ;;  %s4125_s22 = scalar_lea.hbm %s5603_s7, 2048 }
 0x47a   : > { %p4122_p4 = scmp.ne.s32.totalorder %s5546_s16, %s4121_s8  ;;  %p4126_p9 = scmp.lt.u32.totalorder %s5546_s16, %s5603_s7 }
 0x47b   : > { %p4127_p10 = scmp.lt.u32.totalorder %s4125_s22, %s4121_s8  ;;  %p4129_p12 = scmp.lt.u32.totalorder %s4121_s8, %s5546_s16 }
 0x47c   : > { %p4123_p7 = pnand %p4122_p4, %p4265_p5 }
 0x47d   : > { %p4128_p11 = por %p4127_p10, %p4126_p9 }
 0x47e   : > { %p4124_p8 = pneg %p4123_p7 }
 0x47f   : > { %p4130_p13 = por %p4129_p12, %p4128_p11 }
 0x481   : > { %p4131_p0 = pnand %p4130_p13, %p4124_p8 }
 0x483   : > { %4134 = shalt.err (!%p4131_p0)
}
 0x484   : > { %s4186_s21 = smov 128  }
 0x485   : > { %4053 = dma.vmem_to_hbm [thread:$0]  (%p4265_p5), %s5548_s15, 1024, %s5546_s16, %s5554_s28, %s4186_s21, %s4186_s21, %s4173_s23  }
 0x486 PF: > { %p4059_p1 = scmp.ge.s32.totalorder %s4169_s27, 2  ;;  %s3223_s18 = sand.u32 1, %s4157_s24  }
 0x487   : > { %s3224_s9 = scalar_lea.sflag [#allocation7], %s3223_s18 }
 0x488   : > { %p4056_p2 = pnand %p4059_p1, %p4269_p6 }
 0x48a   : > { %4152 = dma.done.wait (!%p4056_p2), %s3224_s9, 1024  }
 0x48b   : > { %4154 = vsyncadd (!%p4056_p2), %s3224_s9, 4294966272  ;;  %p17_p3 = scmp.ge.s32.totalorder %s4252_s30, 4   ;;  %s5606_s24 = smov %s4161_s25 }
 0x48c   : > { %s5607_s25 = smov %s4165_s26  ;;  %s5608_s26 = smov %s4263_s10 }
 0x48d   : > { %s5609_s27 = smov %s4252_s30  ;;  %19 = sbr.rel (!%p17_p3) target bundleno = 3 (0x3), region = 94 }
 0x494   :  { %3229 = vsyncpa [#allocation7], 1 }
 0x495   :  { %3231 = vsyncpa [#allocation7 + $0x1], 1 }

</bundles_post_ra>
